<compile_context>
chip_gen: v7x
topology: tpu7x:2x2x1
jax: 0.10.0
libtpu: 0.0.40
codegen_flags: <defaults>
</compile_context>

<pallas_src>
import jax
import jax.numpy as jnp
from jax import lax
from jax.experimental import pallas as pl
from jax.experimental.pallas import tpu as pltpu


def _round_up(n, m):
    return ((n + m - 1) // m) * m


def _pick_epilogue_dtype(compute_dtype):
    """bf16 epilogue only on chips with a bf16 VPU (v6e / v7x); f32 otherwise."""
    if jnp.dtype(compute_dtype) == jnp.dtype(jnp.float32):
        return jnp.float32
    try:
        kind = jax.devices()[0].device_kind.lower()
    except Exception:  # defensive: unknown backend -> safe f32 epilogue
        return jnp.float32
    if "v6" in kind or "v7" in kind:
        return jnp.bfloat16
    return jnp.float32


def mlp_kernel(x_ref, w1_ref, b1_ref, w2_ref, b2_ref, w3_ref, b3_ref, o_ref):
    cdt = w1_ref.dtype   # MXU operand dtype (bf16 fast path / f32 parity path)
    edt = b1_ref.dtype   # epilogue elementwise dtype (f32, or bf16 on v6e/v7x)

    # In-kernel cast of the x tile (no separate wrapper-side HBM pass over x).
    x = x_ref[...].astype(cdt)

    # fc1 + ReLU: MXU dot with f32 accumulation; bias/ReLU on the VPU in `edt`.
    h1 = jnp.dot(x, w1_ref[...], preferred_element_type=jnp.float32)
    h1 = jnp.maximum(h1.astype(edt) + b1_ref[...], 0.0).astype(cdt)

    # fc2 + ReLU.
    h2 = jnp.dot(h1, w2_ref[...], preferred_element_type=jnp.float32)
    h2 = jnp.maximum(h2.astype(edt) + b2_ref[...], 0.0).astype(cdt)

    # fc3: MXU matmul contracting the hidden axis of both operands so the
    # result is already lane-dense (batch on the lane axis).  w3 is zero-padded
    # to 8 sublane rows; row 0 is the real output row.  b3 is an SMEM scalar.
    y = lax.dot_general(
        w3_ref[...], h2,
        dimension_numbers=(((1,), (1,)), ((), ())),
        preferred_element_type=jnp.float32,
    )                                                    # (8, bb) f32
    o_ref[...] = (y[0:1, :] + b3_ref[0])[None].astype(o_ref.dtype)


def mlp_forward(x, params, *, block_b=2048, compute_dtype=jnp.bfloat16,
                epilogue_dtype=None):
    """x: (B, input_dim) float32. Returns (B,) float32 (matches .squeeze(-1))."""
    w1, b1, w2, b2, w3, b3 = params
    B, input_dim = x.shape
    hidden = w1.shape[1]

    if epilogue_dtype is None:
        epilogue_dtype = _pick_epilogue_dtype(compute_dtype)
    if jnp.dtype(compute_dtype) == jnp.dtype(jnp.float32):
        epilogue_dtype = jnp.float32      # f32 parity path stays all-f32

    # Batch tile: multiple of 128 (lane-dense output, full MXU rows), capped by
    # block_b and by round_up(B/2, 128) so there are >= 2 grid blocks whenever
    # B allows it (v7x dual-TensorCore balance under "parallel" semantics).
    bb = max(128, min(_round_up(block_b, 128), _round_up((B + 1) // 2, 128)))
    b_pad = _round_up(B, bb)
    num_blocks = b_pad // bb

    # x stays f32 in HBM (the bf16 cast happens in-kernel); pad only when B is
    # not a tile multiple.  Padded rows produce garbage that is sliced off.
    if b_pad != B:
        x = jnp.pad(x, ((0, b_pad - B), (0, 0)))

    cdt, edt = compute_dtype, epilogue_dtype
    w1_c = w1.astype(cdt)
    w2_c = w2.astype(cdt)
    b1_e = b1.reshape(1, hidden).astype(edt)
    b2_e = b2.reshape(1, hidden).astype(edt)
    # w3 as an 8-row tile (row 0 real, rows 1..7 zero) -> sublane-aligned MXU fc3.
    w3_pad = jnp.zeros((8, hidden), cdt).at[0].set(w3.reshape(hidden).astype(cdt))
    b3_s = b3.reshape(1).astype(jnp.float32)

    # --- VMEM guardrail: only set vmem_limit_bytes when a big-tile sweep would
    # exceed the v5e 16 MiB scoped default.  Never triggers at small shapes.
    itemsize_c = jnp.dtype(cdt).itemsize
    vmem_need = (
        2 * bb * input_dim * 4                              # double-buffered f32 x tile
        + 2 * bb * hidden * 4                               # h1 / h2 f32 accumulators
        + (input_dim + hidden + 8) * hidden * itemsize_c    # resident weights
        + 2 * 2 * bb * 4                                    # double-buffered output row
        + 4 * hidden * jnp.dtype(edt).itemsize              # biases (tiny)
    )
    compiler_kwargs = dict(dimension_semantics=("parallel",))
    if vmem_need > 12 * 1024 * 1024:
        compiler_kwargs["vmem_limit_bytes"] = int(min(2 * vmem_need, 64 * 1024 * 1024))

    cost = pl.CostEstimate(
        flops=2 * B * (input_dim * hidden + hidden * hidden + hidden),
        transcendentals=0,
        bytes_accessed=(B * input_dim + B) * 4
        + (input_dim * hidden + hidden * hidden + 8 * hidden) * itemsize_c
        + (2 * hidden + 1) * 4,
    )

    out = pl.pallas_call(
        mlp_kernel,
        out_shape=jax.ShapeDtypeStruct((num_blocks, 1, bb), jnp.float32),
        grid_spec=pltpu.PrefetchScalarGridSpec(
            num_scalar_prefetch=0,
            grid=(num_blocks,),
            in_specs=[
                pl.BlockSpec((bb, input_dim), lambda i: (i, 0)),      # x tile (f32)
                pl.BlockSpec((input_dim, hidden), lambda i: (0, 0)),  # W1 (resident)
                pl.BlockSpec((1, hidden), lambda i: (0, 0)),          # b1
                pl.BlockSpec((hidden, hidden), lambda i: (0, 0)),     # W2 (resident)
                pl.BlockSpec((1, hidden), lambda i: (0, 0)),          # b2
                pl.BlockSpec((8, hidden), lambda i: (0, 0)),          # W3 (8 rows)
                pl.BlockSpec(memory_space=pltpu.MemorySpace.SMEM),    # b3 scalar
            ],
            out_specs=pl.BlockSpec((1, 1, bb), lambda i: (i, 0, 0)),  # lane-dense
        ),
        compiler_params=pltpu.CompilerParams(**compiler_kwargs),
        cost_estimate=cost,
    )(x, w1_c, b1_e, w2_c, b2_e, w3_pad, b3_s)

    return out.reshape(-1)[:B]  # squeeze(-1) + drop batch padding


def init_params(key, input_dim, hidden_dim=128):
    """Deterministic init matching nn.Linear's U(-1/sqrt(fan_in), 1/sqrt(fan_in))."""
    ks = jax.random.split(key, 6)

    def linear(kw, kb, fan_in, fan_out):
        bound = 1.0 / jnp.sqrt(fan_in)
        w = jax.random.uniform(kw, (fan_in, fan_out), jnp.float32, -bound, bound)
        b = jax.random.uniform(kb, (1, fan_out), jnp.float32, -bound, bound)
        return w, b

    w1, b1 = linear(ks[0], ks[1], input_dim, hidden_dim)
    w2, b2 = linear(ks[2], ks[3], hidden_dim, hidden_dim)
    w3, b3 = linear(ks[4], ks[5], hidden_dim, 1)
    return (w1, b1, w2, b2, w3, b3)


def mlp_reference(x, params):
    w1, b1, w2, b2, w3, b3 = params
    h = jnp.maximum(x @ w1 + b1, 0.0)
    h = jnp.maximum(h @ w2 + b2, 0.0)
    return (h @ w3 + b3)[:, 0]


if __name__ == "__main__":
    # Full-precision matmuls for both the XLA reference and the kernel trace so
    # the f32-path comparison is meaningful.
    jax.config.update("jax_default_matmul_precision", "highest")

    B, INPUT_DIM, HIDDEN = 16, 32, 128

    key = jax.random.PRNGKey(0)
    kx, kp = jax.random.split(key)
    x = jax.random.normal(kx, (B, INPUT_DIM), dtype=jnp.float32)
    params = init_params(kp, INPUT_DIM, HIDDEN)

    ref = mlp_reference(x, params)

    # f32 MXU path: matches the float32 reference / PyTorch path.
    out_f32 = jax.block_until_ready(mlp_forward(x, params, compute_dtype=jnp.float32))
    assert out_f32.shape == (B,), out_f32.shape
    assert jnp.allclose(out_f32, ref, atol=1e-4, rtol=1e-4), "f32 mismatch vs reference"

    # bf16 MXU path (default fast path; bf16 epilogue auto-enabled on v6e/v7x).
    out_bf16 = jax.block_until_ready(mlp_forward(x, params))
    assert out_bf16.shape == (B,), out_bf16.shape
    assert jnp.allclose(out_bf16, ref, atol=5e-2, rtol=5e-2), "bf16 mismatch vs reference"

    print("KERNEL_OK")
</pallas_src>

<mosaic_0001>
module attributes {stable_mosaic.version = 11 : i64} {
  func.func @mlp_kernel(%arg0: i32, %arg1: memref<128x32xf32, #tpu.memory_space<vmem>>, %arg2: memref<32x128xf32, #tpu.memory_space<vmem>>, %arg3: memref<1x128xf32, #tpu.memory_space<vmem>>, %arg4: memref<128x128xf32, #tpu.memory_space<vmem>>, %arg5: memref<1x128xf32, #tpu.memory_space<vmem>>, %arg6: memref<8x128xf32, #tpu.memory_space<vmem>>, %arg7: memref<1xf32, #tpu.memory_space<smem>>, %arg8: memref<1x1x128xf32, #tpu.memory_space<vmem>>) attributes {dimension_semantics = [#tpu.dimension_semantics<parallel>], iteration_bounds = array<i64: 1>, scalar_prefetch = 0 : i64, scratch_operands = 0 : i64, tpu.core_type = #tpu.core_type<tc>, window_params = [{transform_indices = @transform_0, window_bounds = array<i64: 128, 32>}, {pipeline_mode = #tpu.pipeline_mode<synchronous>, transform_indices = @transform_1, window_bounds = array<i64: 32, 128>}, {pipeline_mode = #tpu.pipeline_mode<synchronous>, transform_indices = @transform_2, window_bounds = array<i64: 1, 128>}, {pipeline_mode = #tpu.pipeline_mode<synchronous>, transform_indices = @transform_3, window_bounds = array<i64: 128, 128>}, {pipeline_mode = #tpu.pipeline_mode<synchronous>, transform_indices = @transform_4, window_bounds = array<i64: 1, 128>}, {pipeline_mode = #tpu.pipeline_mode<synchronous>, transform_indices = @transform_5, window_bounds = array<i64: 8, 128>}, {transform_indices = @transform_6, window_bounds = array<i64: 1>}, {transform_indices = @transform_7, window_bounds = array<i64: 1, 1, 128>}]} {
    %c0 = arith.constant 0 : index
    %c0_0 = arith.constant 0 : index
    %0 = vector.load %arg1[%c0, %c0_0] : memref<128x32xf32, #tpu.memory_space<vmem>>, vector<128x32xf32>
    %c0_1 = arith.constant 0 : index
    %c0_2 = arith.constant 0 : index
    %1 = vector.load %arg2[%c0_1, %c0_2] : memref<32x128xf32, #tpu.memory_space<vmem>>, vector<32x128xf32>
    %cst = arith.constant dense<0.000000e+00> : vector<128x128xf32>
    %2 = tpu.matmul %0, %1, %cst {dimension_numbers = #tpu.dot_dimension_numbers<[1], [0], [0], [1], [0, 0, 1, 1], [], []>, precision = #tpu.contract_precision<fp32>} : vector<128x32xf32>, vector<32x128xf32>, vector<128x128xf32> -> vector<128x128xf32>
    %c0_3 = arith.constant 0 : index
    %c0_4 = arith.constant 0 : index
    %3 = vector.load %arg3[%c0_3, %c0_4] : memref<1x128xf32, #tpu.memory_space<vmem>>, vector<1x128xf32>
    %4 = vector.broadcast %3 : vector<1x128xf32> to vector<128x128xf32>
    %5 = arith.addf %2, %4 : vector<128x128xf32>
    %cst_5 = arith.constant 0.000000e+00 : f32
    %6 = vector.broadcast %cst_5 : f32 to vector<128x128xf32>
    %7 = arith.maximumf %5, %6 : vector<128x128xf32>
    %c0_6 = arith.constant 0 : index
    %c0_7 = arith.constant 0 : index
    %8 = vector.load %arg4[%c0_6, %c0_7] : memref<128x128xf32, #tpu.memory_space<vmem>>, vector<128x128xf32>
    %cst_8 = arith.constant dense<0.000000e+00> : vector<128x128xf32>
    %9 = tpu.matmul %7, %8, %cst_8 {dimension_numbers = #tpu.dot_dimension_numbers<[1], [0], [0], [1], [0, 0, 1, 1], [], []>, precision = #tpu.contract_precision<fp32>} : vector<128x128xf32>, vector<128x128xf32>, vector<128x128xf32> -> vector<128x128xf32>
    %c0_9 = arith.constant 0 : index
    %c0_10 = arith.constant 0 : index
    %10 = vector.load %arg5[%c0_9, %c0_10] : memref<1x128xf32, #tpu.memory_space<vmem>>, vector<1x128xf32>
    %11 = vector.broadcast %10 : vector<1x128xf32> to vector<128x128xf32>
    %12 = arith.addf %9, %11 : vector<128x128xf32>
    %cst_11 = arith.constant 0.000000e+00 : f32
    %13 = vector.broadcast %cst_11 : f32 to vector<128x128xf32>
    %14 = arith.maximumf %12, %13 : vector<128x128xf32>
    %c0_12 = arith.constant 0 : index
    %c0_13 = arith.constant 0 : index
    %15 = vector.load %arg6[%c0_12, %c0_13] : memref<8x128xf32, #tpu.memory_space<vmem>>, vector<8x128xf32>
    %cst_14 = arith.constant dense<0.000000e+00> : vector<8x128xf32>
    %16 = tpu.matmul %15, %14, %cst_14 {dimension_numbers = #tpu.dot_dimension_numbers<[1], [1], [0], [0], [0, 0, 1, 0], [], []>, precision = #tpu.contract_precision<fp32>} : vector<8x128xf32>, vector<128x128xf32>, vector<8x128xf32> -> vector<8x128xf32>
    %17 = vector.extract_strided_slice %16 {offsets = [0, 0], sizes = [1, 128], strides = [1, 1]} : vector<8x128xf32> to vector<1x128xf32>
    %c0_15 = arith.constant 0 : index
    %18 = memref.load %arg7[%c0_15] : memref<1xf32, #tpu.memory_space<smem>>
    %19 = vector.broadcast %18 : f32 to vector<1x128xf32>
    %20 = arith.addf %17, %19 : vector<1x128xf32>
    %21 = vector.shape_cast %20 : vector<1x128xf32> to vector<1x1x128xf32>
    %c0_16 = arith.constant 0 : index
    %c0_17 = arith.constant 0 : index
    %c0_18 = arith.constant 0 : index
    %22 = vector.load %arg8[%c0_16, %c0_17, %c0_18] : memref<1x1x128xf32, #tpu.memory_space<vmem>>, vector<1x1x128xf32>
    tpu.vector_store %arg8[%c0_16, %c0_17, %c0_18], %21 {strides = array<i32>} : memref<1x1x128xf32, #tpu.memory_space<vmem>>, vector<1x1x128xf32>,
    return
  }
  func.func @transform_0(%arg0: i32) -> (i32, i32) {
    %c0_i32 = arith.constant 0 : i32
    %c0_i32_0 = arith.constant 0 : i32
    return %arg0, %c0_i32 : i32, i32
  }
  func.func @transform_1(%arg0: i32) -> (i32, i32) {
    %c0_i32 = arith.constant 0 : i32
    %c0_i32_0 = arith.constant 0 : i32
    %c0_i32_1 = arith.constant 0 : i32
    return %c0_i32, %c0_i32_0 : i32, i32
  }
  func.func @transform_2(%arg0: i32) -> (i32, i32) {
    %c0_i32 = arith.constant 0 : i32
    %c0_i32_0 = arith.constant 0 : i32
    %c0_i32_1 = arith.constant 0 : i32
    return %c0_i32, %c0_i32_0 : i32, i32
  }
  func.func @transform_3(%arg0: i32) -> (i32, i32) {
    %c0_i32 = arith.constant 0 : i32
    %c0_i32_0 = arith.constant 0 : i32
    %c0_i32_1 = arith.constant 0 : i32
    return %c0_i32, %c0_i32_0 : i32, i32
  }
  func.func @transform_4(%arg0: i32) -> (i32, i32) {
    %c0_i32 = arith.constant 0 : i32
    %c0_i32_0 = arith.constant 0 : i32
    %c0_i32_1 = arith.constant 0 : i32
    return %c0_i32, %c0_i32_0 : i32, i32
  }
  func.func @transform_5(%arg0: i32) -> (i32, i32) {
    %c0_i32 = arith.constant 0 : i32
    %c0_i32_0 = arith.constant 0 : i32
    %c0_i32_1 = arith.constant 0 : i32
    return %c0_i32, %c0_i32_0 : i32, i32
  }
  func.func @transform_6(%arg0: i32) -> i32 {
    %c0_i32 = arith.constant 0 : i32
    %c0_i32_0 = arith.constant 0 : i32
    return %c0_i32 : i32
  }
  func.func @transform_7(%arg0: i32) -> (i32, i32, i32) {
    %c0_i32 = arith.constant 0 : i32
    %c0_i32_0 = arith.constant 0 : i32
    %c0_i32_1 = arith.constant 0 : i32
    return %arg0, %c0_i32, %c0_i32_0 : i32, i32, i32
  }
}

</mosaic_0001>

<bundles_post_ra>
// kernel: tpu_custom_call.1
= control target key start
LH: loop header
LB: loop body
LE: loop exit
PB: predicated region body
PF: predicated region fallthrough
CT: control target
= control target key end

     0   :  { %vm55_vm0 = vcmask 261120   ;;  %s6359_s0 = inlined_call_operand.vmem [shape: f32[128,32], index: 0, kind: input, shape index: {}]   ;;  %s6360_s1 = inlined_call_operand.vmem [shape: f32[32,128], index: 1, kind: input, shape index: {}]   ;;  %s6361_s2 = inlined_call_operand.vmem [shape: f32[1,128], index: 2, kind: input, shape index: {}]   ;;  %s6362_s3 = inlined_call_operand.vmem [shape: f32[128,128], index: 3, kind: input, shape index: {}]   ;;  %s6363_s4 = inlined_call_operand.vmem [shape: f32[1,128], index: 4, kind: input, shape index: {}]   ;;  %s6364_s5 = inlined_call_operand.vmem [shape: f32[8,128], index: 5, kind: input, shape index: {}]   ;;  %s6365_s6 = inlined_call_operand.<no memory space> [shape: f32[1], index: 6, kind: input, shape index: {}]   ;;  %s6366_s7 = inlined_call_operand.hbm [shape: f32[1,1,128], index: 7, kind: output, shape index: {}]  }
   0x1   :  { %v44_v0 = vld [vmem:[%s6360_s1] sm:$0xff]  ;;  %v45_v1 = vld [vmem:[%s6360_s1 + $0x8] sm:$0xff]  ;;  %v5046_v2 = vld [vmem:[%s6360_s1 + $0x10] sm:$0xff] }
   0x2   :  { %v105_v3 = vand.u32 4294901760, %v44_v0  ;;  %v108_v4 = vand.u32 4294901760, %v45_v1  ;;  %v5051_v5 = vld [vmem:[%s6360_s1 + $0x18] sm:$0xff]  ;;  %v111_v6 = vand.u32 4294901760, %v5046_v2  ;;  %v28_v7 = vld [vmem:[%s6359_s0] sm:$0xff]  ;;  %v29_v8 = vld [vmem:[%s6359_s0 + $0x8] sm:$0xff] }
   0x3   :  { %v114_v9 = vand.u32 4294901760, %v5051_v5  ;;  %v57_v10 = vsel %vm55_vm0, %v28_v7, 0  ;;  %v60_v11 = vsel %vm55_vm0, %v29_v8, 0  ;;  %v30_v12 = vld [vmem:[%s6359_s0 + $0x10] sm:$0xff]  ;;  %v31_v13 = vld [vmem:[%s6359_s0 + $0x18] sm:$0xff]  ;;  %v32_v18 = vld [vmem:[%s6359_s0 + $0x20] sm:$0xff] }
   0x4   :  { %v5069_v14 = vpack.c.bf16 %v108_v4, %v105_v3  ;;  %v5071_v15 = vand.u32 4294901760, %v57_v10  ;;  %v5073_v16 = vand.u32 4294901760, %v60_v11  ;;  %v5075_v17 = vsub.f32 %v44_v0, %v105_v3  ;;  %v33_v19 = vld [vmem:[%s6359_s0 + $0x28] sm:$0xff] }
   0x5   :  { %v5087_v20 = vpack.c.bf16 %v114_v9, %v111_v6  ;;  %v5089_v21 = vsub.f32 %v45_v1, %v108_v4  ;;  %v63_v22 = vsel %vm55_vm0, %v30_v12, 0  ;;  %v66_v23 = vsel %vm55_vm0, %v31_v13, 0 }
   0x6   :  { %4390 = vmatprep.subr.bf16.mxu0 %v5069_v14  ;;  %v5095_v24 = vsub.f32 %v57_v10, %v5071_v15  ;;  %v5098_v25 = vsub.f32 %v60_v11, %v5073_v16  ;;  %v336_v26 = vand.u32 4294901760, %v5075_v17  ;;  %v5101_v27 = vand.u32 4294901760, %v63_v22 }
   0x7   :  { %4392 = vmatpush3.bf16.msra.mxu0 %v5069_v14  ;;  %v343_v28 = vand.u32 4294901760, %v5089_v21  ;;  %v5105_v29 = vand.u32 4294901760, %v66_v23  ;;  %v69_v30 = vsel %vm55_vm0, %v32_v18, 0  ;;  %v72_v31 = vsel %vm55_vm0, %v33_v19, 0 }
   0x8   :  { %4394 = vmatprep.subr.bf16.mxu0 %v5087_v20  ;;  %v175_v32 = vand.u32 4294901760, %v5095_v24  ;;  %v185_v33 = vand.u32 4294901760, %v5098_v25  ;;  %v337_v34 = vsub.f32 %v5075_v17, %v336_v26  ;;  %v5116_v35 = vsub.f32 %v63_v22, %v5101_v27 }
   0x9   :  { %13 = vsyncpa [#allocation4], 0  ;;  %v344_v36 = vsub.f32 %v5089_v21, %v343_v28  ;;  %v5122_v37 = vsub.f32 %v66_v23, %v5105_v29  ;;  %v5124_v38 = vand.u32 4294901760, %v69_v30  ;;  %v5126_v39 = vand.u32 4294901760, %v72_v31  ;;  %v34_v40 = vld [vmem:[%s6359_s0 + $0x30] sm:$0xff]  ;;  %v35_v49 = vld [vmem:[%s6359_s0 + $0x38] sm:$0xff] }
   0xa   :  { %v176_v41 = vsub.f32 %v5095_v24, %v175_v32  ;;  %v186_v42 = vsub.f32 %v5098_v25, %v185_v33  ;;  %v338_v43 = vand.u32 4294901760, %v337_v34  ;;  %v195_v44 = vand.u32 4294901760, %v5116_v35  ;;  %v36_v50 = vld [vmem:[%s6359_s0 + $0x40] sm:$0xff]  ;;  %v37_v59 = vld [vmem:[%s6359_s0 + $0x48] sm:$0xff]  ;;  %v38_v12 = vld [vmem:[%s6359_s0 + $0x50] sm:$0xff]  ;;  %s4996_s26 = smov [#allocation3]  }
   0xb   :  { %4396 = vmatpush3.bf16.msra.mxu0 %v5087_v20  ;;  %v345_v45 = vand.u32 4294901760, %v344_v36  ;;  %v205_v46 = vand.u32 4294901760, %v5122_v37  ;;  %v5141_v47 = vsub.f32 %v69_v30, %v5124_v38  ;;  %v5144_v48 = vsub.f32 %v72_v31, %v5126_v39  ;;  %v39_v13 = vld [vmem:[%s6359_s0 + $0x58] sm:$0xff]  ;;  %s3227_s27 = sshll.u32 %s4996_s26, 4  ;;  %s3228_s27 = int_to_ptr.vmem [resolvable:$true] %s3227_s27 }
   0xc   :  { %v177_v51 = vand.u32 4294901760, %v176_v41  ;;  %v187_v52 = vand.u32 4294901760, %v186_v42  ;;  %v196_v53 = vsub.f32 %v5116_v35, %v195_v44  ;;  %v75_v54 = vsel %vm55_vm0, %v34_v40, 0  ;;  %s4969_s28 = scalar_lea.vmem %s3228_s27, 16  ;;  %s4973_s29 = scalar_lea.vmem %s3228_s27, 32 }
   0xd   :  { %v4397_v55 = vpack.c.bf16 %v345_v45, %v338_v43  ;;  %v206_v56 = vsub.f32 %v5122_v37, %v205_v46  ;;  %v215_v57 = vand.u32 4294901760, %v5141_v47  ;;  %v225_v58 = vand.u32 4294901760, %v5144_v48  ;;  %p4970_p0 = scmp.ne.s32.totalorder %s3228_s27, %s4969_s28  ;;  %p4974_p1 = scmp.lt.s32.totalorder %s3228_s27, %s3228_s27 }
   0xe   :  { %3659 = vmatprep.mubr.f32.mxu0 %v177_v51  ;;  %v197_v60 = vand.u32 4294901760, %v196_v53  ;;  %v5164_v61 = vand.u32 4294901760, %v75_v54  ;;  %v78_v62 = vsel %vm55_vm0, %v35_v49, 0  ;;  %v81_v63 = vsel %vm55_vm0, %v36_v50, 0  ;;  %v41_v53 = vld [vmem:[%s6359_s0 + $0x68] sm:$0xff]  ;;  %p4975_p2 = scmp.lt.s32.totalorder %s4973_s29, %s4969_s28 }
   0xf   :  { %3660 = vmatmul.mubr.f32.vlgmr.msra.gmra.mrb[0].mxu0 %v187_v52  ;;  %4398 = vmatprep.subr.bf16.mxu0 %v4397_v55  ;;  %v207_v0 = vand.u32 4294901760, %v206_v56  ;;  %v216_v1 = vsub.f32 %v5141_v47, %v215_v57  ;;  %v226_v3 = vsub.f32 %v5144_v48, %v225_v58  ;;  %v5174_v4 = vand.u32 4294901760, %v78_v62  ;;  %v40_v52 = vld [vmem:[%s6359_s0 + $0x60] sm:$0xff] }
  0x10   :  { %4400 = vmatpush3.bf16.msra.mxu0 %v4397_v55  ;;  %3662 = vmatprep.mubr.f32.mxu0 %v197_v60  ;;  %v5177_v7 = vsub.f32 %v75_v54, %v5164_v61  ;;  %v5179_v8 = vand.u32 4294901760, %v81_v63  ;;  %v84_v10 = vsel %vm55_vm0, %v37_v59, 0  ;;  %v5185_v11 = vsub.f32 %v5046_v2, %v111_v6  ;;  %p4976_p3 = por %p4975_p2, %p4974_p1 }
  0x11   :  { %v217_v18 = vand.u32 4294901760, %v216_v1  ;;  %v227_v19 = vand.u32 4294901760, %v226_v3  ;;  %v5194_v22 = vsub.f32 %v78_v62, %v5174_v4  ;;  %v5196_v23 = vand.u32 4294901760, %v84_v10  ;;  %v42_v1 = vld [vmem:[%s6359_s0 + $0x70] sm:$0xff]  ;;  %v43_v3 = vld [vmem:[%s6359_s0 + $0x78] sm:$0xff] }
  0x12   :  { %v235_v30 = vand.u32 4294901760, %v5177_v7  ;;  %v5200_v2 = vsub.f32 %v81_v63, %v5179_v8  ;;  %v350_v6 = vand.u32 4294901760, %v5185_v11  ;;  %v5206_v31 = vsub.f32 %v5051_v5, %v114_v9  ;;  %p4977_p4 = pnand %p4976_p3, %p4970_p0 }
  0x13   :  { %3663 = vmatmul.mubr.f32.gmra.mrb[2].mxu0 %v207_v0  ;;  %v245_v34 = vand.u32 4294901760, %v5194_v22  ;;  %v5210_v36 = vsub.f32 %v84_v10, %v5196_v23  ;;  %v87_v40 = vsel %vm55_vm0, %v38_v12, 0  ;;  %v90_v41 = vsel %vm55_vm0, %v39_v13, 0 }
  0x14   :  { %3665 = vmatprep.mubr.f32.mxu0 %v217_v18  ;;  %v236_v42 = vsub.f32 %v5177_v7, %v235_v30  ;;  %v255_v43 = vand.u32 4294901760, %v5200_v2  ;;  %v351_v5 = vsub.f32 %v5185_v11, %v350_v6  ;;  %v357_v9 = vand.u32 4294901760, %v5206_v31 }
  0x15   :  { %v246_v45 = vsub.f32 %v5194_v22, %v245_v34  ;;  %v6367_v49 = vand.u32 4294901760, %v5210_v36  ;;  %v5224_v50 = vand.u32 4294901760, %v87_v40  ;;  %v5226_v51 = vand.u32 4294901760, %v90_v41 }
  0x16   :  { %v237_v54 = vand.u32 4294901760, %v236_v42  ;;  %v256_v55 = vsub.f32 %v5200_v2, %v255_v43  ;;  %v352_v56 = vand.u32 4294901760, %v351_v5  ;;  %v358_v59 = vsub.f32 %v5206_v31, %v357_v9 }
  0x17   :  { %3666 = vmatmul.mubr.f32.gmra.mrb[4].mxu0 %v227_v19  ;;  %v247_v60 = vand.u32 4294901760, %v246_v45  ;;  %v266_v62 = vsub.f32 %v5210_v36, %v6367_v49  ;;  %v5242_v63 = vsub.f32 %v87_v40, %v5224_v50  ;;  %v5245_v0 = vsub.f32 %v90_v41, %v5226_v51 }
  0x18   :  { %3668 = vmatprep.mubr.f32.mxu0 %v237_v54  ;;  %v257_v10 = vand.u32 4294901760, %v256_v55  ;;  %v359_v12 = vand.u32 4294901760, %v358_v59  ;;  %v93_v13 = vsel %vm55_vm0, %v40_v52, 0  ;;  %v96_v18 = vsel %vm55_vm0, %v41_v53, 0 }
  0x19   :  { %v267_v19 = vand.u32 4294901760, %v266_v62  ;;  %v275_v40 = vand.u32 4294901760, %v5242_v63  ;;  %v6368_v41 = vand.u32 4294901760, %v5245_v0  ;;  %v5257_v42 = vand.u32 4294901760, %v93_v13 }
  0x1a   :  { %v4401_v5 = vpack.c.bf16 %v359_v12, %v352_v56  ;;  %v5259_v45 = vand.u32 4294901760, %v96_v18  ;;  %v99_v49 = vsel %vm55_vm0, %v42_v1, 0  ;;  %v102_v54 = vsel %vm55_vm0, %v43_v3, 0 }
  0x1b   :  { %3669 = vmatmul.mubr.f32.gmra.mrb[6].mxu0 %v247_v60  ;;  %v276_v52 = vsub.f32 %v5242_v63, %v275_v40  ;;  %v286_v53 = vsub.f32 %v5245_v0, %v6368_v41  ;;  %v5270_v55 = vsub.f32 %v93_v13, %v5257_v42  ;;  %v5272_v59 = vand.u32 4294901760, %v99_v49 }
  0x1c   :  { %3671 = vmatprep.mubr.f32.mxu0 %v257_v10  ;;  %4402 = vmatprep.subr.bf16.mxu0 %v4401_v5  ;;  %v5275_v56 = vsub.f32 %v96_v18, %v5259_v45  ;;  %v5277_v62 = vand.u32 4294901760, %v102_v54  ;;  %v4405_v60 = vpack.c.bf16 %v5089_v21, %v5075_v17  ;;  %v5293_v18 = vpack.c.bf16 %v343_v28, %v336_v26 }
  0x1d   :  { %4404 = vmatpush3.bf16.msra.mxu0 %v4401_v5  ;;  %v277_v1 = vand.u32 4294901760, %v276_v52  ;;  %v295_v3 = vand.u32 4294901760, %v5270_v55  ;;  %v5283_v12 = vsub.f32 %v99_v49, %v5272_v59  ;;  %v5295_v41 = vpack.c.bf16 %v357_v9, %v350_v6 }
  0x1e   :  { %v305_v13 = vand.u32 4294901760, %v5275_v56  ;;  %v5287_v10 = vsub.f32 %v102_v54, %v5277_v62  ;;  %4406 = vmatprep.subr.bf16.mxu0 %v4405_v60  ;;  %v287_v5 = vand.u32 4294901760, %v286_v53  ;;  %v4409_v53 = vpack.c.bf16 %v5206_v31, %v5185_v11  ;;  %v5333_v11 = vld [vmem:[%s6362_s3] sm:$0xff]  ;;  %v5338_v31 = vld [vmem:[%s6362_s3 + $0x8] sm:$0xff] }
  0x1f   :  { %3672 = vmatmul.mubr.f32.gmra.mrb[8].mxu0 %v267_v19  ;;  %v296_v49 = vsub.f32 %v5270_v55, %v295_v3  ;;  %v315_v52 = vand.u32 4294901760, %v5283_v12  ;;  %vm4994_vm1 = vmmov 0  }
  0x20   :  { %3674 = vmatprep.mubr.f32.mxu0 %v277_v1  ;;  %v306_v54 = vsub.f32 %v5275_v56, %v305_v13  ;;  %v6373_v17 = vand.u32 4294901760, %v5287_v10  ;;  %v6370_v1 = vand.u32 4294901760, %v5333_v11 }
  0x21   :  { %v297_v21 = vand.u32 4294901760, %v296_v49  ;;  %v316_v26 = vsub.f32 %v5283_v12, %v315_v52  ;;  %v5351_v49 = vld [vmem:[%s6362_s3 + $0x18] sm:$0xff] }
  0x22   :  { %v307_v28 = vand.u32 4294901760, %v306_v54  ;;  %v326_v6 = vsub.f32 %v5287_v10, %v6373_v17 }
  0x23   :  { %3675 = vmatmul.mubr.f32.gmra.mrb[10].mxu0 %v287_v5  ;;  %v317_v9 = vand.u32 4294901760, %v316_v26  ;;  %v6369_v5 = vand.u32 4294901760, %v5338_v31  ;;  %v5362_v26 = vld [vmem:[%s6362_s3 + $0x28] sm:$0xff] }
  0x24   :  { %3677 = vmatprep.mubr.f32.mxu0 %v297_v21  ;;  %v327_v19 = vand.u32 4294901760, %v326_v6  ;;  %v5357_v21 = vld [vmem:[%s6362_s3 + $0x20] sm:$0xff] }
  0x25   :  { %v5369_v6 = vpack.c.bf16 %v6369_v5, %v6370_v1  ;;  %v5385_v5 = vld [vmem:[%s6362_s3 + $0x30] sm:$0xff]  ;;  %v5390_v1 = vld [vmem:[%s6362_s3 + $0x38] sm:$0xff] }
  0x26   :  { %v1295_v17 = vand.u32 4294901760, %v5390_v1 }
  0x27   :  { %3678 = vmatmul.mubr.f32.gmra.mrb[12].mxu0 %v307_v28  ;;  %v6371_v28 = vand.u32 4294901760, %v5351_v49  ;;  %4438 = vmatprep.subr.bf16.mxu1 %v5369_v6 }
  0x28   :  { %3680 = vmatprep.mubr.f32.mxu0 %v317_v9  ;;  %4440 = vmatpush3.bf16.msra.mxu1 %v5369_v6 }
  0x2b   :  { %3681 = vmatmul.mubr.f32.gmra.mrb[14].mxu0 %v327_v19  ;;  %v1286_v19 = vand.u32 4294901760, %v5357_v21 }
  0x2c   :  { %3691 = vmatprep.mubr.f32.mxu0 %v5071_v15 }
  0x2f   :  { %3692 = vmatmul.mubr.f32.vlgmr.msra.gmra.mrb[0].mxu0 %v5073_v16 }
  0x30   :  { %4408 = vmatpush3.bf16.msra.mxu0 %v4405_v60  ;;  %3694 = vmatprep.mubr.f32.mxu0 %v5101_v27  ;;  %v5343_v60 = vld [vmem:[%s6362_s3 + $0x10] sm:$0xff] }
  0x31   :  { %4410 = vmatprep.subr.bf16.mxu0 %v4409_v53  ;;  %v6372_v54 = vand.u32 4294901760, %v5343_v60 }
  0x33   :  { %3695 = vmatmul.mubr.f32.gmra.mrb[2].mxu0 %v5105_v29  ;;  %v5376_v9 = vpack.c.bf16 %v6371_v28, %v6372_v54  ;;  %v1292_v54 = vand.u32 4294901760, %v5385_v5 }
  0x34   :  { %3697 = vmatprep.mubr.f32.mxu0 %v5124_v38  ;;  %4412 = vmatpush3.bf16.msra.mxu0 %v4409_v53  ;;  %v6374_v53 = vand.u32 4294901760, %v5362_v26 }
  0x35   :  { %4414 = vmatprep.subr.bf16.mxu0 %v5069_v14  ;;  %4442 = vmatprep.subr.bf16.mxu1 %v5376_v9 }
  0x36   :  { %v5401_v28 = vpack.c.bf16 %v6374_v53, %v1286_v19  ;;  %4444 = vmatpush3.bf16.msra.mxu1 %v5376_v9  ;;  %v5415_v53 = vpack.c.bf16 %v1295_v17, %v1292_v54 }
  0x37   :  { %3698 = vmatmul.mubr.f32.gmra.mrb[4].mxu0 %v5126_v39 }
  0x38   :  { %3700 = vmatprep.mubr.f32.mxu0 %v5164_v61  ;;  %4446 = vmatprep.subr.bf16.mxu1 %v5401_v28 }
  0x3a   :  { %4448 = vmatpush3.bf16.msra.mxu1 %v5401_v28 }
  0x3b   :  { %3701 = vmatmul.mubr.f32.gmra.mrb[6].mxu0 %v5174_v4  ;;  %4450 = vmatprep.subr.bf16.mxu1 %v5415_v53 }
  0x3c   :  { %3703 = vmatprep.mubr.f32.mxu0 %v5179_v8 }
  0x3e   :  { %4452 = vmatpush3.bf16.msra.mxu1 %v5415_v53 }
  0x3f   :  { %3704 = vmatmul.mubr.f32.gmra.mrb[8].mxu0 %v5196_v23 }
  0x40   :  { %3706 = vmatprep.mubr.f32.mxu0 %v5224_v50 }
  0x43   :  { %3707 = vmatmul.mubr.f32.gmra.mrb[10].mxu0 %v5226_v51 }
  0x44   :  { %3709 = vmatprep.mubr.f32.mxu0 %v5257_v42 }
  0x47   :  { %3710 = vmatmul.mubr.f32.gmra.mrb[12].mxu0 %v5259_v45 }
  0x48   :  { %3712 = vmatprep.mubr.f32.mxu0 %v5272_v59 }
  0x4b   :  { %3713 = vmatmul.mubr.f32.gmra.mrb[14].mxu0 %v5277_v62 }
  0x4c   :  { %3723 = vmatprep.mubr.f32.mxu0 %v5095_v24  ;;  %v6417_v24 = vand.u32 4294901760, %v5210_v36 }
  0x4f   :  { %3724 = vmatmul.mubr.f32.vlgmr.msra.gmra.mrb[0].mxu0 %v5098_v25  ;;  %v6418_v25 = vand.u32 4294901760, %v5245_v0 }
  0x50   :  { %4416 = vmatpush3.bf16.msra.mxu0 %v5069_v14  ;;  %3726 = vmatprep.mubr.f32.mxu0 %v5116_v35 }
  0x51   :  { %4418 = vmatprep.subr.bf16.mxu0 %v5087_v20 }
  0x53   :  { %3727 = vmatmul.mubr.f32.gmra.mrb[2].mxu0 %v5122_v37 }
  0x54   :  { %3729 = vmatprep.mubr.f32.mxu0 %v5141_v47  ;;  %4420 = vmatpush3.bf16.msra.mxu0 %v5087_v20 }
  0x55   :  { %4422 = vmatprep.subr.bf16.mxu0 %v5293_v18 }
  0x57   :  { %3730 = vmatmul.mubr.f32.gmra.mrb[4].mxu0 %v5144_v48 }
  0x58   :  { %3732 = vmatprep.mubr.f32.mxu0 %v5177_v7  ;;  %v1264_v7 = vld [vmem:[%s6362_s3 + $0x70] sm:$0xff] }
  0x5b   :  { %3733 = vmatmul.mubr.f32.gmra.mrb[6].mxu0 %v5194_v22  ;;  %v1316_v22 = vand.u32 4294901760, %v1264_v7 }
  0x5c   :  { %3735 = vmatprep.mubr.f32.mxu0 %v5200_v2 }
  0x5f   :  { %3736 = vmatmul.mubr.f32.gmra.mrb[8].mxu0 %v5210_v36 }
  0x60   :  { %3738 = vmatprep.mubr.f32.mxu0 %v5242_v63 }
  0x63   :  { %3739 = vmatmul.mubr.f32.gmra.mrb[10].mxu0 %v5245_v0 }
  0x64   :  { %3741 = vmatprep.mubr.f32.mxu0 %v5270_v55 }
  0x67   :  { %3742 = vmatmul.mubr.f32.gmra.mrb[12].mxu0 %v5275_v56 }
  0x68   :  { %3744 = vmatprep.mubr.f32.mxu0 %v5283_v12 }
  0x6b   :  { %3745 = vmatmul.mubr.f32.gmra.mrb[14].mxu0 %v5287_v10 }
  0x6c   :  { %3755 = vmatprep.mubr.f32.mxu0 %v175_v32  ;;  %v6419_v32 = vand.u32 4294901760, %v5287_v10 }
  0x6f   :  { %3756 = vmatmul.mubr.f32.vlgmr.msra.gmra.mrb[0].mxu0 %v185_v33  ;;  %v1261_v33 = vld [vmem:[%s6362_s3 + $0x58] sm:$0xff] }
  0x70   :  { %4424 = vmatpush3.bf16.msra.mxu0 %v5293_v18  ;;  %3758 = vmatprep.mubr.f32.mxu0 %v195_v44  ;;  %v1307_v37 = vand.u32 4294901760, %v1261_v33  ;;  %v1263_v44 = vld [vmem:[%s6362_s3 + $0x68] sm:$0xff] }
  0x71   :  { %4426 = vmatprep.subr.bf16.mxu0 %v5295_v41  ;;  %v1313_v47 = vand.u32 4294901760, %v1263_v44 }
  0x73   :  { %3759 = vmatmul.mubr.f32.gmra.mrb[2].mxu0 %v205_v46 }
  0x74   :  { %3761 = vmatprep.mubr.f32.mxu0 %v215_v57  ;;  %4428 = vmatpush3.bf16.msra.mxu0 %v5295_v41  ;;  %v6422_v57 = vand.u32 4294901760, %v5333_v11 }
  0x75   :  { %4430 = vmatprep.subr.bf16.mxu0 %v5069_v14 }
  0x77   :  { %3762 = vmatmul.mubr.f32.gmra.mrb[4].mxu0 %v225_v58  ;;  %v5532_v58 = vsub.f32 %v5333_v11, %v6422_v57  ;;  %v5588_v11 = vsub.f32 %v1263_v44, %v1313_v47 }
  0x78   :  { %3764 = vmatprep.mubr.f32.mxu0 %v235_v30 }
  0x79   :  { %6423 = vst [vmem:[#allocation8_spill] sm:$0xff] %v5532_v58  ;;  %v6391_v30 = vand.u32 4294901760, %v5532_v58  ;;  %6432 = vst [vmem:[#allocation16_spill] sm:$0xff] %v5588_v11 }
  0x7b   :  { %3765 = vmatmul.mubr.f32.gmra.mrb[6].mxu0 %v245_v34  ;;  %v1518_v36 = vsub.f32 %v5532_v58, %v6391_v30 }
  0x7c   :  { %3767 = vmatprep.mubr.f32.mxu0 %v255_v43 }
  0x7f   :  { %3768 = vmatmul.mubr.f32.gmra.mrb[8].mxu0 %v6417_v24 }
  0x80   :  { %3770 = vmatprep.mubr.f32.mxu0 %v275_v40 }
  0x83   :  { %3771 = vmatmul.mubr.f32.gmra.mrb[10].mxu0 %v6418_v25 }
  0x84   :  { %3773 = vmatprep.mubr.f32.mxu0 %v295_v3 }
  0x87   :  { %3774 = vmatmul.mubr.f32.gmra.mrb[12].mxu0 %v305_v13 }
  0x88   :  { %3776 = vmatprep.mubr.f32.mxu0 %v315_v52 }
  0x8b   :  { %3777 = vmatmul.mubr.f32.gmra.mrb[14].mxu0 %v6419_v32 }
  0x8c   :  { %3787 = vmatprep.mubr.f32.mxu0 %v5071_v15 }
  0x8f   :  { %3788 = vmatmul.mubr.f32.vlgmr.msra.gmra.mrb[0].mxu0 %v5073_v16 }
  0x90   :  { %4432 = vmatpush3.bf16.msra.mxu0 %v5069_v14  ;;  %3790 = vmatprep.mubr.f32.mxu0 %v5101_v27  ;;  %v1258_v14 = vld [vmem:[%s6362_s3 + $0x40] sm:$0xff] }
  0x91   :  { %4434 = vmatprep.subr.bf16.mxu0 %v5087_v20 }
  0x93   :  { %3791 = vmatmul.mubr.f32.gmra.mrb[2].mxu0 %v5105_v29 }
  0x94   :  { %3793 = vmatprep.mubr.f32.mxu0 %v5124_v38  ;;  %4436 = vmatpush3.bf16.msra.mxu0 %v5087_v20 }
  0x97   :  { %3794 = vmatmul.mubr.f32.gmra.mrb[4].mxu0 %v5126_v39 }
  0x98   :  { %3796 = vmatprep.mubr.f32.mxu0 %v5164_v61 }
  0x9b   :  { %3797 = vmatmul.mubr.f32.gmra.mrb[6].mxu0 %v5174_v4 }
  0x9c   :  { %3799 = vmatprep.mubr.f32.mxu0 %v5179_v8 }
  0x9f   :  { %3800 = vmatmul.mubr.f32.gmra.mrb[8].mxu0 %v5196_v23 }
  0xa0   :  { %3802 = vmatprep.mubr.f32.mxu0 %v5224_v50 }
  0xa3   :  { %3803 = vmatmul.mubr.f32.gmra.mrb[10].mxu0 %v5226_v51 }
  0xa4   :  { %3805 = vmatprep.mubr.f32.mxu0 %v5257_v42 }
  0xa7   :  { %3806 = vmatmul.mubr.f32.gmra.mrb[12].mxu0 %v5259_v45 }
  0xa8   :  { %3808 = vmatprep.mubr.f32.mxu0 %v5272_v59 }
  0xab   :  { %3809 = vmatmul.mubr.f32.gmra.mrb[14].mxu0 %v5277_v62 }
  0xac   :  { %3819 = vmatprep.mubr.f32.mxu0 %v5071_v15  ;;  %v1259_v15 = vld [vmem:[%s6362_s3 + $0x48] sm:$0xff] }
  0xad   :  { %v1301_v20 = vand.u32 4294901760, %v1259_v15 }
  0xaf   :  { %3820 = vmatmul.mubr.f32.vlgmr.msra.gmra.mrb[0].mxu0 %v5073_v16  ;;  %v1298_v16 = vand.u32 4294901760, %v1258_v14  ;;  %v5564_v40 = vsub.f32 %v1259_v15, %v1301_v20 }
  0xb0   :  { %3822 = vmatprep.mubr.f32.mxu0 %v5101_v27 }
  0xb1   :  { %v5507_v27 = vpack.c.bf16 %v1301_v20, %v1298_v16  ;;  %v5562_v0 = vsub.f32 %v1258_v14, %v1298_v16  ;;  %6428 = vst [vmem:[#allocation12_spill] sm:$0xff] %v5564_v40  ;;  %v6377_v14 = vand.u32 4294901760, %v5588_v11 }
  0xb3   :  { %3823 = vmatmul.mubr.f32.gmra.mrb[2].mxu0 %v5105_v29  ;;  %v1260_v29 = vld [vmem:[%s6362_s3 + $0x50] sm:$0xff]  ;;  %4454 = vmatprep.subr.bf16.mxu1 %v5507_v27  ;;  %6427 = vst [vmem:[#allocation11_spill] sm:$0xff] %v5562_v0  ;;  %v6382_v41 = vand.u32 4294901760, %v5562_v0  ;;  %v1609_v20 = vsub.f32 %v5588_v11, %v6377_v14 }
  0xb4   :  { %3825 = vmatprep.mubr.f32.mxu0 %v5124_v38  ;;  %v1304_v35 = vand.u32 4294901760, %v1260_v29  ;;  %4456 = vmatpush3.bf16.msra.mxu1 %v5507_v27 }
  0xb6   :  { %v5517_v38 = vpack.c.bf16 %v1307_v37, %v1304_v35  ;;  %v5571_v55 = vsub.f32 %v1260_v29, %v1304_v35  ;;  %v5602_v29 = vsub.f32 %v1264_v7, %v1316_v22 }
  0xb7   :  { %3826 = vmatmul.mubr.f32.gmra.mrb[4].mxu0 %v5126_v39  ;;  %v1262_v39 = vld [vmem:[%s6362_s3 + $0x60] sm:$0xff] }
  0xb8   :  { %3828 = vmatprep.mubr.f32.mxu0 %v5164_v61  ;;  %6420 = vst [vmem:[#allocation6_spill] sm:$0xff] %v5517_v38  ;;  %4458 = vmatprep.subr.bf16.mxu1 %v5517_v38  ;;  %v1310_v46 = vand.u32 4294901760, %v1262_v39  ;;  %v6424_v61 = vand.u32 4294901760, %v5338_v31  ;;  %6429 = vst [vmem:[#allocation13_spill] sm:$0xff] %v5571_v55  ;;  %v6380_v3 = vand.u32 4294901760, %v5571_v55 }
  0xb9   :  { %4460 = vmatpush3.bf16.msra.mxu1 %v5517_v38  ;;  %6433 = vst [vmem:[#allocation17_spill] sm:$0xff] %v5602_v29 }
  0xba   :  { %v5527_v48 = vpack.c.bf16 %v1313_v47, %v1310_v46  ;;  %v1588_v10 = vsub.f32 %v5571_v55, %v6380_v3  ;;  %v5586_v52 = vsub.f32 %v1262_v39, %v1310_v46  ;;  %v6376_v39 = vand.u32 4294901760, %v5602_v29 }
  0xbb   :  { %3829 = vmatmul.mubr.f32.gmra.mrb[6].mxu0 %v5174_v4  ;;  %v5537_v4 = vsub.f32 %v5338_v31, %v6424_v61 }
  0xbc   :  { %3831 = vmatprep.mubr.f32.mxu0 %v5179_v8  ;;  %6421 = vst [vmem:[#allocation7_spill] sm:$0xff] %v5527_v48  ;;  %v1265_v8 = vld [vmem:[%s6362_s3 + $0x78] sm:$0xff]  ;;  %4462 = vmatprep.subr.bf16.mxu1 %v5527_v48  ;;  %6431 = vst [vmem:[#allocation15_spill] sm:$0xff] %v5586_v52  ;;  %v1589_v24 = vand.u32 4294901760, %v1588_v10  ;;  %v6378_v32 = vand.u32 4294901760, %v5586_v52  ;;  %v1616_v47 = vsub.f32 %v5602_v29, %v6376_v39  ;;  %v6437_v10 = vand.u32 4294901760, %v5362_v26 }
  0xbd   :  { %6425 = vst [vmem:[#allocation9_spill] sm:$0xff] %v5537_v4  ;;  %v6390_v2 = vand.u32 4294901760, %v5537_v4  ;;  %4464 = vmatpush3.bf16.msra.mxu1 %v5527_v48 }
  0xbe   :  { %v1602_v16 = vsub.f32 %v5586_v52, %v6378_v32  ;;  %v1617_v61 = vand.u32 4294901760, %v1616_v47 }
  0xbf   :  { %3832 = vmatmul.mubr.f32.gmra.mrb[8].mxu0 %v5196_v23  ;;  %v1319_v23 = vand.u32 4294901760, %v1265_v8  ;;  %v1525_v43 = vsub.f32 %v5537_v4, %v6390_v2 }
  0xc0   :  { %3834 = vmatprep.mubr.f32.mxu0 %v5224_v50  ;;  %v1519_v50 = vand.u32 4294901760, %v1518_v36  ;;  %v1603_v35 = vand.u32 4294901760, %v1602_v16 }
  0xc1   :  { %v5549_v34 = vpack.c.bf16 %v1319_v23, %v1316_v22  ;;  %v5620_v22 = vpack.c.bf16 %v5537_v4, %v5532_v58 }
  0xc3   :  { %3835 = vmatmul.mubr.f32.gmra.mrb[10].mxu0 %v5226_v51  ;;  %6426 = vst [vmem:[#allocation10_spill] sm:$0xff] %v5549_v34  ;;  %4466 = vmatprep.subr.bf16.mxu1 %v5549_v34  ;;  %v1526_v51 = vand.u32 4294901760, %v1525_v43  ;;  %v5632_v43 = vpack.c.bf16 %v5588_v11, %v5586_v52 }
  0xc4   :  { %3837 = vmatprep.mubr.f32.mxu0 %v5257_v42  ;;  %4468 = vmatpush3.bf16.msra.mxu1 %v5549_v34  ;;  %v6381_v42 = vand.u32 4294901760, %v5564_v40 }
  0xc5   :  { %v5559_v63 = vpack.c.bf16 %v1526_v51, %v1519_v50  ;;  %v6435_v51 = vand.u32 4294901760, %v5343_v60 }
  0xc6   :  { %v1581_v56 = vsub.f32 %v5564_v40, %v6381_v42 }
  0xc7   :  { %3838 = vmatmul.mubr.f32.gmra.mrb[12].mxu0 %v5259_v45  ;;  %4470 = vmatprep.subr.bf16.mxu1 %v5559_v63  ;;  %v1574_v45 = vsub.f32 %v5562_v0, %v6382_v41 }
  0xc8   :  { %3840 = vmatprep.mubr.f32.mxu0 %v5272_v59  ;;  %v5573_v59 = vsub.f32 %v1261_v33, %v1307_v37  ;;  %v1582_v13 = vand.u32 4294901760, %v1581_v56  ;;  %v5604_v33 = vsub.f32 %v1265_v8, %v1319_v23  ;;  %v1610_v37 = vand.u32 4294901760, %v1609_v20 }
  0xc9   :  { %v5624_v23 = vpack.c.bf16 %v5564_v40, %v5562_v0  ;;  %v6436_v56 = vand.u32 4294901760, %v5351_v49 }
  0xca   :  { %6430 = vst [vmem:[#allocation14_spill] sm:$0xff] %v5573_v59  ;;  %v6379_v12 = vand.u32 4294901760, %v5573_v59  ;;  %6434 = vst [vmem:[#allocation18_spill] sm:$0xff] %v5604_v33  ;;  %v6375_v44 = vand.u32 4294901760, %v5604_v33  ;;  %v5608_v46 = vpack.c.bf16 %v1610_v37, %v1603_v35  ;;  %v5628_v36 = vpack.c.bf16 %v5573_v59, %v5571_v55 }
  0xcb   :  { %3841 = vmatmul.mubr.f32.gmra.mrb[14].mxu0 %v5277_v62  ;;  %v1575_v62 = vand.u32 4294901760, %v1574_v45  ;;  %v5636_v50 = vpack.c.bf16 %v5604_v33, %v5602_v29  ;;  %v5641_v45 = vsub.f32 %v5343_v60, %v6435_v51  ;;  %v5661_v60 = vld [vmem:[%s6361_s2] ss:$0 sm:$0xff] }
  0xcc   :  { %v1595_v18 = vsub.f32 %v5573_v59, %v6379_v12  ;;  %v1623_v57 = vsub.f32 %v5604_v33, %v6375_v44 }
  0xcd   :  { %v5590_v31 = vpack.c.bf16 %v1582_v13, %v1575_v62  ;;  %v5646_v62 = vsub.f32 %v5351_v49, %v6436_v56  ;;  %v5651_v13 = vsub.f32 %v5357_v21, %v1286_v19  ;;  %v5684_v56 = vsub.f32 %v5385_v5, %v1292_v54 }
  0xce   :  { %v1596_v25 = vand.u32 4294901760, %v1595_v18  ;;  %v1624_v7 = vand.u32 4294901760, %v1623_v57  ;;  %v5656_v18 = vsub.f32 %v5362_v26, %v6437_v10 }
  0xcf   :  { %v6385_v49 = vand.u32 4294901760, %v5646_v62 }
  0xd0   :  { %v5594_v15 = vpack.c.bf16 %v1596_v25, %v1589_v24  ;;  %v5616_v8 = vpack.c.bf16 %v1624_v7, %v1617_v61  ;;  %v6386_v24 = vand.u32 4294901760, %v5641_v45  ;;  %v6384_v25 = vand.u32 4294901760, %v5651_v13 }
  0xd1   :  { %v6383_v16 = vand.u32 4294901760, %v5656_v18  ;;  %v1539_v37 = vsub.f32 %v5646_v62, %v6385_v49 }
  0xd2   :  { %v1532_v35 = vsub.f32 %v5641_v45, %v6386_v24  ;;  %v1546_v57 = vsub.f32 %v5651_v13, %v6384_v25 }
  0xd3   :  { %v1553_v61 = vsub.f32 %v5656_v18, %v6383_v16  ;;  %v1540_v14 = vand.u32 4294901760, %v1539_v37 }
  0xd4   :  { %v1533_v39 = vand.u32 4294901760, %v1532_v35  ;;  %v1547_v54 = vand.u32 4294901760, %v1546_v57 }
  0xd5   :  { %v1554_v12 = vand.u32 4294901760, %v1553_v61 }
  0xd7   :  { %v5719_v16 = vpack.c.bf16 %v1554_v12, %v1547_v54 }
 0x182   :  { %v3821_v21 = vpop.f32.mrb[0].mxu0 }
 0x183   :  { %v4773_v19 = vadd.f32 %v3821_v21, %v5661_v60  ;;  %v1140_v20 = vpop.f32.mrb[1].mxu0 }
 0x184   :  { %v4774_v26 = vadd.f32 %v5661_v60, %v1140_v20  ;;  %v5692_v20 = vsub.f32 %v5390_v1, %v1295_v17  ;;  %v6389_v17 = vand.u32 4294901760, %v5684_v56 }
 0x185   :  { %v1235_v47 = vmax.f32 %v4773_v19, 0.0 }
 0x186   :  { %v1234_v7 = vmax.f32 %v4774_v26, 0.0  ;;  %v3824_v51 = vpop.f32.mrb[2].mxu0  ;;  %v6393_v37 = vand.u32 4294901760, %v5692_v20 }
 0x187   :  { %v5686_v10 = vand.u32 4294901760, %v1235_v47  ;;  %v4775_v21 = vadd.f32 %v3824_v51, %v5661_v60  ;;  %v1152_v19 = vpop.f32.mrb[3].mxu0 }
 0x188   :  { %v5694_v44 = vand.u32 4294901760, %v1234_v7  ;;  %v4776_v26 = vadd.f32 %v5661_v60, %v1152_v19 }
 0x189   :  { %v5698_v32 = vsub.f32 %v1235_v47, %v5686_v10  ;;  %v1237_v5 = vmax.f32 %v4775_v21, 0.0 }
 0x18a   :  { %v5701_v51 = vsub.f32 %v1234_v7, %v5694_v44  ;;  %v1236_v3 = vmax.f32 %v4776_v26, 0.0  ;;  %v3827_v42 = vpop.f32.mrb[4].mxu0  ;;  %v4473_v7 = vpack.c.bf16 %v1540_v14, %v1533_v39  ;;  %v1560_v14 = vsub.f32 %v5684_v56, %v6389_v17 }
 0x18b   :  { %v5704_v1 = vand.u32 4294901760, %v1237_v5  ;;  %v4777_v41 = vadd.f32 %v3827_v42, %v5661_v60  ;;  %v1164_v19 = vpop.f32.mrb[5].mxu0  ;;  %v6387_v35 = vand.u32 4294901760, %v5698_v32 }
 0x18c   :  { %v5709_v47 = vand.u32 4294901760, %v1236_v3  ;;  %v4778_v57 = vadd.f32 %v5661_v60, %v1164_v19  ;;  %v6388_v61 = vand.u32 4294901760, %v5701_v51 }
 0x18d   :  { %v5714_v21 = vsub.f32 %v1237_v5, %v5704_v1  ;;  %v1239_v26 = vmax.f32 %v4777_v41, 0.0  ;;  %v1367_v42 = vsub.f32 %v5698_v32, %v6387_v35 }
 0x18e   :  { %v5722_v25 = vsub.f32 %v1236_v3, %v5709_v47  ;;  %v1238_v49 = vmax.f32 %v4778_v57, 0.0  ;;  %v3830_v24 = vpop.f32.mrb[6].mxu0  ;;  %v1357_v19 = vsub.f32 %v5701_v51, %v6388_v61  ;;  %v1567_v3 = vsub.f32 %v5692_v20, %v6393_v37 }
 0x18f   :  { %v5730_v41 = vand.u32 4294901760, %v1239_v26  ;;  %v4779_v39 = vadd.f32 %v3830_v24, %v5661_v60  ;;  %v1176_v5 = vpop.f32.mrb[7].mxu0  ;;  %v6396_v12 = vand.u32 4294901760, %v5714_v21  ;;  %v1368_v30 = vand.u32 4294901760, %v1367_v42 }
 0x190   :  { %v5737_v54 = vand.u32 4294901760, %v1238_v49  ;;  %v4780_v57 = vadd.f32 %v5661_v60, %v1176_v5  ;;  %v1358_v35 = vand.u32 4294901760, %v1357_v19  ;;  %v6398_v61 = vand.u32 4294901760, %v5722_v25 }
 0x191   :  { %v5742_v17 = vsub.f32 %v1239_v26, %v5730_v41  ;;  %v1241_v2 = vmax.f32 %v4779_v39, 0.0  ;;  %v1387_v24 = vsub.f32 %v5714_v21, %v6396_v12  ;;  %v1561_v5 = vand.u32 4294901760, %v1560_v14 }
 0x192   :  { %v5748_v33 = vsub.f32 %v1238_v49, %v5737_v54  ;;  %v1240_v37 = vmax.f32 %v4780_v57, 0.0  ;;  %v3833_v29 = vpop.f32.mrb[8].mxu0  ;;  %3875 = vmatprep.mubr.f32.mxu1 %v1358_v35  ;;  %v1377_v19 = vsub.f32 %v5722_v25, %v6398_v61  ;;  %v1568_v12 = vand.u32 4294901760, %v1567_v3 }
 0x193   :  { %v5753_v11 = vand.u32 4294901760, %v1241_v2  ;;  %v4781_v26 = vadd.f32 %v3833_v29, %v5661_v60  ;;  %v1188_v42 = vpop.f32.mrb[9].mxu0  ;;  %3876 = vmatmul.mubr.f32.vlgmr.msra.gmra.mrb[0].mxu1 %v1368_v30  ;;  %v6401_v39 = vand.u32 4294901760, %v5742_v17  ;;  %v1388_v59 = vand.u32 4294901760, %v1387_v24 }
 0x194   :  { %v5757_v52 = vand.u32 4294901760, %v1240_v37  ;;  %v4782_v49 = vadd.f32 %v5661_v60, %v1188_v42  ;;  %4472 = vmatpush3.bf16.msra.mxu1 %v5559_v63  ;;  %v1378_v35 = vand.u32 4294901760, %v1377_v19  ;;  %v6403_v57 = vand.u32 4294901760, %v5748_v33 }
 0x195   :  { %v5763_v14 = vsub.f32 %v1241_v2, %v5753_v11  ;;  %v1243_v61 = vmax.f32 %v4781_v26, 0.0  ;;  %4474 = vmatprep.subr.bf16.mxu1 %v4473_v7  ;;  %v1407_v30 = vsub.f32 %v5742_v17, %v6401_v39  ;;  %v4481_v55 = vpack.c.bf16 %v1568_v12, %v1561_v5 }
 0x196   :  { %v5769_v29 = vsub.f32 %v1240_v37, %v5757_v52  ;;  %v1242_v3 = vmax.f32 %v4782_v49, 0.0  ;;  %v3836_v42 = vpop.f32.mrb[10].mxu0  ;;  %3878 = vmatprep.mubr.f32.mxu1 %v1378_v35  ;;  %v1397_v63 = vsub.f32 %v5748_v33, %v6403_v57 }
 0x197   :  { %v5774_v19 = vand.u32 4294901760, %v1243_v61  ;;  %v4783_v2 = vadd.f32 %v3836_v42, %v5661_v60  ;;  %v1200_v24 = vpop.f32.mrb[11].mxu0  ;;  %3879 = vmatmul.mubr.f32.gmra.mrb[2].mxu1 %v1388_v59  ;;  %v6405_v26 = vand.u32 4294901760, %v5763_v14  ;;  %v1408_v0 = vand.u32 4294901760, %v1407_v30 }
 0x198   :  { %v5778_v39 = vand.u32 4294901760, %v1242_v3  ;;  %v4784_v37 = vadd.f32 %v5661_v60, %v1200_v24  ;;  %4476 = vmatpush3.bf16.msra.mxu1 %v4473_v7  ;;  %v1398_v49 = vand.u32 4294901760, %v1397_v63  ;;  %v6406_v35 = vand.u32 4294901760, %v5769_v29 }
 0x199   :  { %v5783_v40 = vsub.f32 %v1243_v61, %v5774_v19  ;;  %v1245_v57 = vmax.f32 %v4783_v2, 0.0  ;;  %4478 = vmatprep.subr.bf16.mxu1 %v5719_v16  ;;  %v1427_v59 = vsub.f32 %v5763_v14, %v6405_v26 }
 0x19a   :  { %v5790_v12 = vsub.f32 %v1242_v3, %v5778_v39  ;;  %v1244_v5 = vmax.f32 %v4784_v37, 0.0  ;;  %v3839_v42 = vpop.f32.mrb[12].mxu0  ;;  %3881 = vmatprep.mubr.f32.mxu1 %v1398_v49  ;;  %v1417_v7 = vsub.f32 %v5769_v29, %v6406_v35 }
 0x19b   :  { %v5795_v61 = vand.u32 4294901760, %v1245_v57  ;;  %v4785_v30 = vadd.f32 %v3839_v42, %v5661_v60  ;;  %v1212_v63 = vpop.f32.mrb[13].mxu0  ;;  %3882 = vmatmul.mubr.f32.gmra.mrb[4].mxu1 %v1408_v0  ;;  %v6411_v2 = vand.u32 4294901760, %v5783_v40  ;;  %v1428_v4 = vand.u32 4294901760, %v1427_v59 }
 0x19c   :  { %v5799_v24 = vand.u32 4294901760, %v1244_v5  ;;  %v4786_v3 = vadd.f32 %v5661_v60, %v1212_v63  ;;  %4480 = vmatpush3.bf16.msra.mxu1 %v5719_v16  ;;  %v1418_v37 = vand.u32 4294901760, %v1417_v7  ;;  %v6412_v49 = vand.u32 4294901760, %v5790_v12 }
 0x19d   :  { %v5805_v26 = vsub.f32 %v1245_v57, %v5795_v61  ;;  %v1247_v35 = vmax.f32 %v4785_v30, 0.0  ;;  %4482 = vmatprep.subr.bf16.mxu1 %v4481_v55  ;;  %v1447_v0 = vsub.f32 %v5783_v40, %v6411_v2 }
 0x19e   :  { %v5811_v42 = vsub.f32 %v1244_v5, %v5799_v24  ;;  %v1246_v58 = vmax.f32 %v4786_v3, 0.0  ;;  %v3842_v63 = vpop.f32.mrb[14].mxu0  ;;  %3884 = vmatprep.mubr.f32.mxu1 %v1418_v37  ;;  %v1437_v16 = vsub.f32 %v5790_v12, %v6412_v49 }
 0x19f   :  { %v5816_v7 = vand.u32 4294901760, %v1247_v35  ;;  %v4787_v57 = vadd.f32 %v3842_v63, %v5661_v60  ;;  %v1224_v59 = vpop.f32.mrb[15].mxu0  ;;  %3885 = vmatmul.mubr.f32.gmra.mrb[6].mxu1 %v1428_v4  ;;  %v1466_v30 = vand.u32 4294901760, %v5805_v26  ;;  %v1448_v48 = vand.u32 4294901760, %v1447_v0 }
 0x1a0   :  { %v5820_v34 = vand.u32 4294901760, %v1246_v58  ;;  %v4788_v5 = vadd.f32 %v5661_v60, %v1224_v59  ;;  %4484 = vmatpush3.bf16.msra.mxu1 %v4481_v55  ;;  %v1438_v3 = vand.u32 4294901760, %v1437_v16  ;;  %v1456_v37 = vand.u32 4294901760, %v5811_v42 }
 0x1a1   :  { %v5825_v2 = vsub.f32 %v1247_v35, %v5816_v7  ;;  %v1249_v49 = vmax.f32 %v4787_v57, 0.0  ;;  %4486 = vmatprep.subr.bf16.mxu1 %v5590_v31  ;;  %v1467_v4 = vsub.f32 %v5805_v26, %v1466_v30 }
 0x1a2   :  { %v5832_v63 = vsub.f32 %v1246_v58, %v5820_v34  ;;  %v1248_v38 = vmax.f32 %v4788_v5, 0.0  ;;  %3887 = vmatprep.mubr.f32.mxu1 %v1438_v3  ;;  %v1457_v55 = vsub.f32 %v5811_v42, %v1456_v37 }
 0x1a3   :  { %v5837_v60 = vand.u32 4294901760, %v1249_v49  ;;  %3888 = vmatmul.mubr.f32.gmra.mrb[8].mxu1 %v1448_v48  ;;  %v1486_v35 = vand.u32 4294901760, %v5825_v2  ;;  %v1468_v59 = vand.u32 4294901760, %v1467_v4 }
 0x1a4   :  { %v5840_v0 = vand.u32 4294901760, %v1248_v38  ;;  %4488 = vmatpush3.bf16.msra.mxu1 %v5590_v31  ;;  %v1458_v16 = vand.u32 4294901760, %v1457_v55  ;;  %v1476_v57 = vand.u32 4294901760, %v5832_v63 }
 0x1a5   :  { %v5845_v58 = vsub.f32 %v1249_v49, %v5837_v60  ;;  %4490 = vmatprep.subr.bf16.mxu1 %v5594_v15  ;;  %v1487_v5 = vsub.f32 %v5825_v2, %v1486_v35 }
 0x1a6   :  { %v5852_v48 = vsub.f32 %v1248_v38, %v5840_v0  ;;  %3890 = vmatprep.mubr.f32.mxu1 %v1458_v16  ;;  %v1477_v31 = vsub.f32 %v5832_v63, %v1476_v57 }
 0x1a7   :  { %3891 = vmatmul.mubr.f32.gmra.mrb[10].mxu1 %v1468_v59  ;;  %v1506_v3 = vand.u32 4294901760, %v5845_v58  ;;  %v1488_v55 = vand.u32 4294901760, %v1487_v5  ;;  %v4505_v5 = vpack.c.bf16 %v5646_v62, %v5641_v45 }
 0x1a8   :  { %4492 = vmatpush3.bf16.msra.mxu1 %v5594_v15  ;;  %v1478_v49 = vand.u32 4294901760, %v1477_v31  ;;  %v1496_v4 = vand.u32 4294901760, %v5852_v48  ;;  %v6443_v31 = vld [vmem:[#allocation9_spill] sm:$0xff] }
 0x1a9   :  { %4494 = vmatprep.subr.bf16.mxu1 %v5608_v46  ;;  %v1507_v38 = vsub.f32 %v5845_v58, %v1506_v3 }
 0x1aa   :  { %3893 = vmatprep.mubr.f32.mxu1 %v1478_v49  ;;  %v1497_v16 = vsub.f32 %v5852_v48, %v1496_v4  ;;  %v6444_v49 = vand.u32 4294901760, %v6443_v31  ;;  %v6456_v31 = vand.u32 4294901760, %v5742_v17 }
 0x1ab   :  { %3894 = vmatmul.mubr.f32.gmra.mrb[12].mxu1 %v1488_v55  ;;  %v1508_v15 = vand.u32 4294901760, %v1507_v38  ;;  %v6445_v38 = vand.u32 4294901760, %v5701_v51 }
 0x1ac   :  { %4496 = vmatpush3.bf16.msra.mxu1 %v5608_v46  ;;  %v1498_v59 = vand.u32 4294901760, %v1497_v16  ;;  %v4509_v46 = vpack.c.bf16 %v5656_v18, %v5651_v13  ;;  %v6446_v16 = vand.u32 4294901760, %v5641_v45  ;;  %v6453_v45 = vand.u32 4294901760, %v5748_v33 }
 0x1ad   :  { %4498 = vmatprep.subr.bf16.mxu1 %v5616_v8 }
 0x1ae   :  { %3896 = vmatprep.mubr.f32.mxu1 %v1498_v59  ;;  %v6447_v59 = vand.u32 4294901760, %v5646_v62  ;;  %v6455_v62 = vand.u32 4294901760, %v5692_v20 }
 0x1af   :  { %3897 = vmatmul.mubr.f32.gmra.mrb[14].mxu1 %v1508_v15 }
 0x1b0   :  { %4500 = vmatpush3.bf16.msra.mxu1 %v5616_v8  ;;  %3931 = vmatprep.mubr.f32.mxu1 %v5694_v44  ;;  %v4513_v8 = vpack.c.bf16 %v5692_v20, %v5684_v56  ;;  %v4569_v15 = vpack.c.bf16 %v6447_v59, %v6446_v16  ;;  %v6464_v20 = vld [vmem:[#allocation13_spill] sm:$0xff]  ;;  %v6466_v16 = vld [vmem:[#allocation14_spill] sm:$0xff] }
 0x1b1   :  { %4502 = vmatprep.subr.bf16.mxu1 %v5620_v22 }
 0x1b3   :  { %3932 = vmatmul.mubr.f32.vlgmr.msra.gmra.mrb[0].mxu1 %v5686_v10 }
 0x1b4   :  { %3934 = vmatprep.mubr.f32.mxu1 %v5709_v47  ;;  %4504 = vmatpush3.bf16.msra.mxu1 %v5620_v22  ;;  %v6438_v22 = vld [vmem:[#allocation6_spill] sm:$0xff] }
 0x1b5   :  { %4506 = vmatprep.subr.bf16.mxu1 %v4505_v5 }
 0x1b7   :  { %3935 = vmatmul.mubr.f32.gmra.mrb[2].mxu1 %v5704_v1 }
 0x1b8   :  { %3937 = vmatprep.mubr.f32.mxu1 %v5737_v54  ;;  %4508 = vmatpush3.bf16.msra.mxu1 %v4505_v5  ;;  %v6448_v5 = vand.u32 4294901760, %v5698_v32 }
 0x1b9   :  { %4510 = vmatprep.subr.bf16.mxu1 %v4509_v46 }
 0x1bb   :  { %3938 = vmatmul.mubr.f32.gmra.mrb[4].mxu1 %v5730_v41 }
 0x1bc   :  { %3940 = vmatprep.mubr.f32.mxu1 %v5757_v52  ;;  %4512 = vmatpush3.bf16.msra.mxu1 %v4509_v46  ;;  %v6449_v46 = vand.u32 4294901760, %v5722_v25 }
 0x1bd   :  { %4514 = vmatprep.subr.bf16.mxu1 %v4513_v8 }
 0x1bf   :  { %3941 = vmatmul.mubr.f32.gmra.mrb[6].mxu1 %v5753_v11 }
 0x1c0   :  { %3943 = vmatprep.mubr.f32.mxu1 %v5778_v39  ;;  %4516 = vmatpush3.bf16.msra.mxu1 %v4513_v8  ;;  %v6450_v8 = vand.u32 4294901760, %v5651_v13  ;;  %v6457_v13 = vand.u32 4294901760, %v5769_v29 }
 0x1c1   :  { %4518 = vmatprep.subr.bf16.mxu1 %v5624_v23 }
 0x1c3   :  { %3944 = vmatmul.mubr.f32.gmra.mrb[8].mxu1 %v5774_v19 }
 0x1c4   :  { %3946 = vmatprep.mubr.f32.mxu1 %v5799_v24  ;;  %4520 = vmatpush3.bf16.msra.mxu1 %v5624_v23  ;;  %v6439_v23 = vld [vmem:[#allocation7_spill] sm:$0xff] }
 0x1c5   :  { %4522 = vmatprep.subr.bf16.mxu1 %v5628_v36 }
 0x1c7   :  { %3947 = vmatmul.mubr.f32.gmra.mrb[10].mxu1 %v5795_v61 }
 0x1c8   :  { %3949 = vmatprep.mubr.f32.mxu1 %v5820_v34  ;;  %4524 = vmatpush3.bf16.msra.mxu1 %v5628_v36  ;;  %v6440_v36 = vld [vmem:[#allocation10_spill] sm:$0xff] }
 0x1c9   :  { %4526 = vmatprep.subr.bf16.mxu1 %v5632_v43 }
 0x1cb   :  { %3950 = vmatmul.mubr.f32.gmra.mrb[12].mxu1 %v5816_v7 }
 0x1cc   :  { %3952 = vmatprep.mubr.f32.mxu1 %v5840_v0  ;;  %4528 = vmatpush3.bf16.msra.mxu1 %v5632_v43  ;;  %v6441_v43 = vld [vmem:[#allocation8_spill] sm:$0xff] }
 0x1cd   :  { %4530 = vmatprep.subr.bf16.mxu1 %v5636_v50 }
 0x1cf   :  { %3953 = vmatmul.mubr.f32.gmra.mrb[14].mxu1 %v5837_v60 }
 0x1d0   :  { %4532 = vmatpush3.bf16.msra.mxu1 %v5636_v50  ;;  %3987 = vmatprep.mubr.f32.mxu1 %v5701_v51  ;;  %v6442_v50 = vand.u32 4294901760, %v6441_v43  ;;  %v6451_v43 = vand.u32 4294901760, %v5656_v18  ;;  %v6458_v18 = vld [vmem:[#allocation11_spill] sm:$0xff] }
 0x1d1   :  { %4534 = vmatprep.subr.bf16.mxu1 %v5369_v6 }
 0x1d2   :  { %v4565_v55 = vpack.c.bf16 %v6444_v49, %v6442_v50  ;;  %v4573_v51 = vpack.c.bf16 %v6451_v43, %v6450_v8  ;;  %v6452_v50 = vand.u32 4294901760, %v5714_v21  ;;  %v6460_v49 = vld [vmem:[#allocation12_spill] sm:$0xff] }
 0x1d3   :  { %3988 = vmatmul.mubr.f32.vlgmr.msra.gmra.mrb[0].mxu1 %v5698_v32  ;;  %v6454_v32 = vand.u32 4294901760, %v5684_v56  ;;  %v6463_v56 = vand.u32 4294901760, %v5790_v12 }
 0x1d4   :  { %3990 = vmatprep.mubr.f32.mxu1 %v5722_v25  ;;  %4536 = vmatpush3.bf16.msra.mxu1 %v5369_v6 }
 0x1d5   :  { %4538 = vmatprep.subr.bf16.mxu1 %v5376_v9  ;;  %v4577_v25 = vpack.c.bf16 %v6455_v62, %v6454_v32 }
 0x1d7   :  { %3991 = vmatmul.mubr.f32.gmra.mrb[2].mxu1 %v5714_v21  ;;  %v6459_v21 = vand.u32 4294901760, %v6458_v18 }
 0x1d8   :  { %3993 = vmatprep.mubr.f32.mxu1 %v5748_v33  ;;  %4540 = vmatpush3.bf16.msra.mxu1 %v5376_v9  ;;  %v6461_v33 = vand.u32 4294901760, %v6460_v49 }
 0x1d9   :  { %4542 = vmatprep.subr.bf16.mxu1 %v5401_v28 }
 0x1db   :  { %3994 = vmatmul.mubr.f32.gmra.mrb[4].mxu1 %v5742_v17  ;;  %v6465_v17 = vand.u32 4294901760, %v6464_v20 }
 0x1dc   :  { %3996 = vmatprep.mubr.f32.mxu1 %v5769_v29  ;;  %4544 = vmatpush3.bf16.msra.mxu1 %v5401_v28  ;;  %v6467_v29 = vand.u32 4294901760, %v6466_v16 }
 0x1dd   :  { %4546 = vmatprep.subr.bf16.mxu1 %v5415_v53 }
 0x1de   :  { %v4585_v59 = vpack.c.bf16 %v6467_v29, %v6465_v17 }
 0x1df   :  { %3997 = vmatmul.mubr.f32.gmra.mrb[6].mxu1 %v5763_v14 }
 0x1e0   :  { %3999 = vmatprep.mubr.f32.mxu1 %v5790_v12  ;;  %4548 = vmatpush3.bf16.msra.mxu1 %v5415_v53 }
 0x1e1   :  { %4550 = vmatprep.subr.bf16.mxu1 %v5507_v27 }
 0x1e3   :  { %4000 = vmatmul.mubr.f32.gmra.mrb[8].mxu1 %v5783_v40 }
 0x1e4   :  { %4002 = vmatprep.mubr.f32.mxu1 %v5811_v42  ;;  %4552 = vmatpush3.bf16.msra.mxu1 %v5507_v27 }
 0x1e5   :  { %4554 = vmatprep.subr.bf16.mxu1 %v6438_v22 }
 0x1e7   :  { %4003 = vmatmul.mubr.f32.gmra.mrb[10].mxu1 %v5805_v26 }
 0x1e8   :  { %4005 = vmatprep.mubr.f32.mxu1 %v5832_v63  ;;  %4556 = vmatpush3.bf16.msra.mxu1 %v6438_v22 }
 0x1e9   :  { %4558 = vmatprep.subr.bf16.mxu1 %v6439_v23 }
 0x1eb   :  { %4006 = vmatmul.mubr.f32.gmra.mrb[12].mxu1 %v5825_v2 }
 0x1ec   :  { %4008 = vmatprep.mubr.f32.mxu1 %v5852_v48  ;;  %4560 = vmatpush3.bf16.msra.mxu1 %v6439_v23 }
 0x1ed   :  { %4562 = vmatprep.subr.bf16.mxu1 %v6440_v36 }
 0x1ef   :  { %4009 = vmatmul.mubr.f32.gmra.mrb[14].mxu1 %v5845_v58 }
 0x1f0   :  { %4564 = vmatpush3.bf16.msra.mxu1 %v6440_v36  ;;  %4043 = vmatprep.mubr.f32.mxu1 %v6445_v38  ;;  %v6462_v38 = vand.u32 4294901760, %v5763_v14  ;;  %v6469_v14 = vld [vmem:[#allocation15_spill] sm:$0xff] }
 0x1f1   :  { %4566 = vmatprep.subr.bf16.mxu1 %v4565_v55 }
 0x1f3   :  { %4044 = vmatmul.mubr.f32.vlgmr.msra.gmra.mrb[0].mxu1 %v6448_v5  ;;  %v6470_v5 = vand.u32 4294901760, %v6469_v14 }
 0x1f4   :  { %4046 = vmatprep.mubr.f32.mxu1 %v6449_v46  ;;  %4568 = vmatpush3.bf16.msra.mxu1 %v4565_v55  ;;  %v4581_v55 = vpack.c.bf16 %v6461_v33, %v6459_v21  ;;  %v6471_v46 = vld [vmem:[#allocation16_spill] sm:$0xff] }
 0x1f5   :  { %4570 = vmatprep.subr.bf16.mxu1 %v4569_v15  ;;  %v6472_v12 = vand.u32 4294901760, %v6471_v46 }
 0x1f7   :  { %4047 = vmatmul.mubr.f32.gmra.mrb[2].mxu1 %v6452_v50  ;;  %v4589_v8 = vpack.c.bf16 %v6472_v12, %v6470_v5 }
 0x1f8   :  { %4049 = vmatprep.mubr.f32.mxu1 %v6453_v45  ;;  %4572 = vmatpush3.bf16.msra.mxu1 %v4569_v15  ;;  %v6468_v15 = vand.u32 4294901760, %v5783_v40  ;;  %v6473_v40 = vld [vmem:[#allocation17_spill] sm:$0xff] }
 0x1f9   :  { %4574 = vmatprep.subr.bf16.mxu1 %v4573_v51  ;;  %v6474_v43 = vand.u32 4294901760, %v6473_v40 }
 0x1fb   :  { %4050 = vmatmul.mubr.f32.gmra.mrb[4].mxu1 %v6456_v31 }
 0x1fc   :  { %4052 = vmatprep.mubr.f32.mxu1 %v6457_v13  ;;  %4576 = vmatpush3.bf16.msra.mxu1 %v4573_v51  ;;  %v6475_v51 = vld [vmem:[#allocation18_spill] sm:$0xff] }
 0x1fd   :  { %4578 = vmatprep.subr.bf16.mxu1 %v4577_v25  ;;  %v6476_v42 = vand.u32 4294901760, %v6475_v51 }
 0x1ff   :  { %4053 = vmatmul.mubr.f32.gmra.mrb[6].mxu1 %v6462_v38 }
 0x200   :  { %4055 = vmatprep.mubr.f32.mxu1 %v6463_v56  ;;  %4580 = vmatpush3.bf16.msra.mxu1 %v4577_v25 }
 0x201   :  { %4582 = vmatprep.subr.bf16.mxu1 %v4581_v55 }
 0x203   :  { %4056 = vmatmul.mubr.f32.gmra.mrb[8].mxu1 %v6468_v15 }
 0x204   :  { %4058 = vmatprep.mubr.f32.mxu1 %v1456_v37  ;;  %4584 = vmatpush3.bf16.msra.mxu1 %v4581_v55  ;;  %v4593_v37 = vpack.c.bf16 %v6476_v42, %v6474_v43 }
 0x205   :  { %4586 = vmatprep.subr.bf16.mxu1 %v4585_v59 }
 0x207   :  { %4059 = vmatmul.mubr.f32.gmra.mrb[10].mxu1 %v1466_v30 }
 0x208   :  { %4061 = vmatprep.mubr.f32.mxu1 %v1476_v57  ;;  %4588 = vmatpush3.bf16.msra.mxu1 %v4585_v59 }
 0x209   :  { %4590 = vmatprep.subr.bf16.mxu1 %v4589_v8 }
 0x20b   :  { %4062 = vmatmul.mubr.f32.gmra.mrb[12].mxu1 %v1486_v35 }
 0x20c   :  { %4064 = vmatprep.mubr.f32.mxu1 %v1496_v4  ;;  %4592 = vmatpush3.bf16.msra.mxu1 %v4589_v8 }
 0x20d   :  { %4594 = vmatprep.subr.bf16.mxu1 %v4593_v37 }
 0x20f   :  { %4065 = vmatmul.mubr.f32.gmra.mrb[14].mxu1 %v1506_v3 }
 0x210   :  { %4596 = vmatpush3.bf16.msra.mxu1 %v4593_v37  ;;  %4099 = vmatprep.mubr.f32.mxu1 %v5694_v44 }
 0x211   :  { %4598 = vmatprep.subr.bf16.mxu1 %v5369_v6 }
 0x213   :  { %4100 = vmatmul.mubr.f32.vlgmr.msra.gmra.mrb[0].mxu1 %v5686_v10 }
 0x214   :  { %4102 = vmatprep.mubr.f32.mxu1 %v5709_v47  ;;  %4600 = vmatpush3.bf16.msra.mxu1 %v5369_v6  ;;  %v4995_v6 = vmov 0.0  }
 0x215   :  { %4602 = vmatprep.subr.bf16.mxu1 %v5376_v9  ;;  %4211 = vmatprep.mubr.msk.f32.mxu0 %vm4994_vm1, %v4995_v6 }
 0x217   :  { %4103 = vmatmul.mubr.f32.gmra.mrb[2].mxu1 %v5704_v1 }
 0x218   :  { %4105 = vmatprep.mubr.f32.mxu1 %v5737_v54  ;;  %4604 = vmatpush3.bf16.msra.mxu1 %v5376_v9  ;;  %v6055_v9 = vld [vmem:[%s6363_s4] ss:$0 sm:$0xff] }
 0x219   :  { %4606 = vmatprep.subr.bf16.mxu1 %v5401_v28 }
 0x21b   :  { %4106 = vmatmul.mubr.f32.gmra.mrb[4].mxu1 %v5730_v41 }
 0x21c   :  { %4108 = vmatprep.mubr.f32.mxu1 %v5757_v52  ;;  %4608 = vmatpush3.bf16.msra.mxu1 %v5401_v28  ;;  %v4993_v28 = vmov 0.0|0.0  }
 0x21d   :  { %4610 = vmatprep.subr.bf16.mxu1 %v5415_v53  ;;  %4629 = vmatprep.subr.bf16.mxu0 %v4993_v28 }
 0x21f   :  { %4109 = vmatmul.mubr.f32.gmra.mrb[6].mxu1 %v5753_v11 }
 0x220   :  { %4111 = vmatprep.mubr.f32.mxu1 %v5778_v39  ;;  %4612 = vmatpush3.bf16.msra.mxu1 %v5415_v53 }
 0x221   :  { %4614 = vmatprep.subr.bf16.mxu1 %v5507_v27 }
 0x223   :  { %4112 = vmatmul.mubr.f32.gmra.mrb[8].mxu1 %v5774_v19 }
 0x224   :  { %4114 = vmatprep.mubr.f32.mxu1 %v5799_v24  ;;  %4616 = vmatpush3.bf16.msra.mxu1 %v5507_v27 }
 0x225   :  { %4618 = vmatprep.subr.bf16.mxu1 %v6438_v22 }
 0x227   :  { %4115 = vmatmul.mubr.f32.gmra.mrb[10].mxu1 %v5795_v61 }
 0x228   :  { %4117 = vmatprep.mubr.f32.mxu1 %v5820_v34  ;;  %4620 = vmatpush3.bf16.msra.mxu1 %v6438_v22 }
 0x229   :  { %4622 = vmatprep.subr.bf16.mxu1 %v6439_v23 }
 0x22b   :  { %4118 = vmatmul.mubr.f32.gmra.mrb[12].mxu1 %v5816_v7 }
 0x22c   :  { %4120 = vmatprep.mubr.f32.mxu1 %v5840_v0  ;;  %4624 = vmatpush3.bf16.msra.mxu1 %v6439_v23 }
 0x22d   :  { %4626 = vmatprep.subr.bf16.mxu1 %v6440_v36 }
 0x22f   :  { %4121 = vmatmul.mubr.f32.gmra.mrb[14].mxu1 %v5837_v60 }
 0x230   :  { %4628 = vmatpush3.bf16.msra.mxu1 %v6440_v36  ;;  %4155 = vmatprep.mubr.f32.mxu1 %v5694_v44 }
 0x231   :  { %4653 = vmatprep.subr.bf16.mxu1 %v4993_v28 }
 0x233   :  { %4156 = vmatmul.mubr.f32.vlgmr.msra.gmra.mrb[0].mxu1 %v5686_v10 }
 0x234   :  { %4158 = vmatprep.mubr.f32.mxu1 %v5709_v47 }
 0x237   :  { %4159 = vmatmul.mubr.f32.gmra.mrb[2].mxu1 %v5704_v1 }
 0x238   :  { %4161 = vmatprep.mubr.f32.mxu1 %v5737_v54 }
 0x23b   :  { %4162 = vmatmul.mubr.f32.gmra.mrb[4].mxu1 %v5730_v41 }
 0x23c   :  { %4164 = vmatprep.mubr.f32.mxu1 %v5757_v52 }
 0x23f   :  { %4165 = vmatmul.mubr.f32.gmra.mrb[6].mxu1 %v5753_v11 }
 0x240   :  { %4167 = vmatprep.mubr.f32.mxu1 %v5778_v39 }
 0x243   :  { %4168 = vmatmul.mubr.f32.gmra.mrb[8].mxu1 %v5774_v19 }
 0x244   :  { %4170 = vmatprep.mubr.f32.mxu1 %v5799_v24 }
 0x247   :  { %4171 = vmatmul.mubr.f32.gmra.mrb[10].mxu1 %v5795_v61 }
 0x248   :  { %4173 = vmatprep.mubr.f32.mxu1 %v5820_v34 }
 0x24b   :  { %4174 = vmatmul.mubr.f32.gmra.mrb[12].mxu1 %v5816_v7 }
 0x24c   :  { %4176 = vmatprep.mubr.f32.mxu1 %v5840_v0 }
 0x24f   :  { %4177 = vmatmul.mubr.f32.gmra.mrb[14].mxu1 %v5837_v60 }
 0x250   :  { %4246 = vmatprep.mubr.msk.f32.mxu1 %vm4994_vm1, %v4995_v6 }
 0x306   :  { %v4157_v53 = vpop.f32.mrb[0].mxu1 }
 0x307   :  { %v4789_v27 = vadd.f32 %v4157_v53, %v6055_v9  ;;  %v2465_v34 = vpop.f32.mrb[1].mxu1 }
 0x308   :  { %v4790_v52 = vadd.f32 %v6055_v9, %v2465_v34 }
 0x309   :  { %v2560_v11 = vmax.f32 %v4789_v27, 0.0 }
 0x30a   :  { %v2559_v44 = vmax.f32 %v4790_v52, 0.0  ;;  %v4160_v10 = vpop.f32.mrb[2].mxu1 }
 0x30b   :  { %v2580_v1 = vand.u32 4294901760, %v2560_v11  ;;  %v4791_v47 = vadd.f32 %v4160_v10, %v6055_v9  ;;  %v2477_v41 = vpop.f32.mrb[3].mxu1 }
 0x30c   :  { %v2577_v54 = vand.u32 4294901760, %v2559_v44  ;;  %v4792_v39 = vadd.f32 %v6055_v9, %v2477_v41 }
 0x30d   :  { %v6061_v19 = vsub.f32 %v2560_v11, %v2580_v1  ;;  %v2562_v26 = vmax.f32 %v4791_v47, 0.0 }
 0x30e   :  { %v6063_v61 = vpack.c.bf16 %v2580_v1, %v2577_v54  ;;  %v6065_v2 = vsub.f32 %v2559_v44, %v2577_v54  ;;  %v2561_v24 = vmax.f32 %v4792_v39, 0.0  ;;  %v4163_v7 = vpop.f32.mrb[4].mxu1 }
 0x30f   :  { %v2677_v30 = vand.u32 4294901760, %v6061_v19  ;;  %v2586_v63 = vand.u32 4294901760, %v2562_v26  ;;  %v4793_v60 = vadd.f32 %v4163_v7, %v6055_v9  ;;  %v2489_v35 = vpop.f32.mrb[5].mxu1 }
 0x310   :  { %v2670_v0 = vand.u32 4294901760, %v6065_v2  ;;  %v2583_v57 = vand.u32 4294901760, %v2561_v24  ;;  %v4794_v58 = vadd.f32 %v6055_v9, %v2489_v35  ;;  %4631 = vmatpush3.bf16.xpose.msra.mxu0 %v6063_v61  ;;  %v4678_v48 = vpack.c.bf16 %v6061_v19, %v6065_v2 }
 0x311   :  { %v2678_v3 = vsub.f32 %v6061_v19, %v2677_v30  ;;  %v6077_v4 = vsub.f32 %v2562_v26, %v2586_v63  ;;  %v2564_v22 = vmax.f32 %v4793_v60, 0.0  ;;  %4632 = vmatprep.subr.bf16.mxu0 %v4993_v28 }
 0x312   :  { %v2671_v23 = vsub.f32 %v6065_v2, %v2670_v0  ;;  %v6083_v36 = vpack.c.bf16 %v2586_v63, %v2583_v57  ;;  %v6085_v50 = vsub.f32 %v2561_v24, %v2583_v57  ;;  %v2563_v45 = vmax.f32 %v4794_v58, 0.0  ;;  %v4166_v32 = vpop.f32.mrb[6].mxu1 }
 0x313   :  { %v2679_v62 = vand.u32 4294901760, %v2678_v3  ;;  %v2691_v25 = vand.u32 4294901760, %v6077_v4  ;;  %v2592_v31 = vand.u32 4294901760, %v2564_v22  ;;  %v4795_v13 = vadd.f32 %v4166_v32, %v6055_v9  ;;  %v2501_v18 = vpop.f32.mrb[7].mxu1 }
 0x314   :  { %v2672_v21 = vand.u32 4294901760, %v2671_v23  ;;  %v2684_v49 = vand.u32 4294901760, %v6085_v50  ;;  %v2589_v33 = vand.u32 4294901760, %v2563_v45  ;;  %v4796_v55 = vadd.f32 %v6055_v9, %v2501_v18 }
 0x315   :  { %v2692_v38 = vsub.f32 %v6077_v4, %v2691_v25  ;;  %v6094_v56 = vsub.f32 %v2564_v22, %v2592_v31  ;;  %v2566_v20 = vmax.f32 %v4795_v13, 0.0  ;;  %v4681_v17 = vpack.c.bf16 %v6077_v4, %v6085_v50 }
 0x316   :  { %v2685_v16 = vsub.f32 %v6085_v50, %v2684_v49  ;;  %v6101_v29 = vpack.c.bf16 %v2592_v31, %v2589_v33  ;;  %v6103_v59 = vsub.f32 %v2563_v45, %v2589_v33  ;;  %v2565_v15 = vmax.f32 %v4796_v55, 0.0  ;;  %v4169_v14 = vpop.f32.mrb[8].mxu1 }
 0x317   :  { %v2693_v5 = vand.u32 4294901760, %v2692_v38  ;;  %v2705_v46 = vand.u32 4294901760, %v6094_v56  ;;  %v2598_v12 = vand.u32 4294901760, %v2566_v20  ;;  %v4797_v8 = vadd.f32 %v4169_v14, %v6055_v9  ;;  %v2513_v40 = vpop.f32.mrb[9].mxu1 }
 0x318   :  { %v2686_v43 = vand.u32 4294901760, %v2685_v16  ;;  %v2698_v51 = vand.u32 4294901760, %v6103_v59  ;;  %v2595_v42 = vand.u32 4294901760, %v2565_v15  ;;  %v4798_v37 = vadd.f32 %v6055_v9, %v2513_v40  ;;  %4634 = vmatpush3.bf16.xpose.msra.mxu0 %v6083_v36 }
 0x319   :  { %v2706_v53 = vsub.f32 %v6094_v56, %v2705_v46  ;;  %v6113_v27 = vsub.f32 %v2566_v20, %v2598_v12  ;;  %v2568_v34 = vmax.f32 %v4797_v8, 0.0  ;;  %v4654_v52 = vpack.c.bf16 %v2679_v62, %v2672_v21  ;;  %4635 = vmatprep.subr.bf16.mxu0 %v4993_v28 }
 0x31a   :  { %v2699_v11 = vsub.f32 %v6103_v59, %v2698_v51  ;;  %v6119_v44 = vpack.c.bf16 %v2598_v12, %v2595_v42  ;;  %v6121_v10 = vsub.f32 %v2565_v15, %v2595_v42  ;;  %v2567_v1 = vmax.f32 %v4798_v37, 0.0  ;;  %v4172_v47 = vpop.f32.mrb[10].mxu1 }
 0x31b   :  { %v2707_v41 = vand.u32 4294901760, %v2706_v53  ;;  %v2719_v54 = vand.u32 4294901760, %v6113_v27  ;;  %v2604_v39 = vand.u32 4294901760, %v2568_v34  ;;  %4655 = vmatpush3.bf16.xpose.msra.mxu1 %v4654_v52  ;;  %v4799_v26 = vadd.f32 %v4172_v47, %v6055_v9  ;;  %v2525_v24 = vpop.f32.mrb[11].mxu1 }
 0x31c   :  { %v2700_v7 = vand.u32 4294901760, %v2699_v11  ;;  %v2712_v63 = vand.u32 4294901760, %v6121_v10  ;;  %v2601_v60 = vand.u32 4294901760, %v2567_v1  ;;  %v4800_v35 = vadd.f32 %v6055_v9, %v2525_v24  ;;  %4656 = vmatprep.subr.bf16.mxu1 %v4993_v28 }
 0x31d   :  { %v2720_v57 = vsub.f32 %v6113_v27, %v2719_v54  ;;  %v6131_v58 = vsub.f32 %v2568_v34, %v2604_v39  ;;  %v2570_v3 = vmax.f32 %v4799_v26, 0.0  ;;  %v4657_v22 = vpack.c.bf16 %v2693_v5, %v2686_v43 }
 0x31e   :  { %v2713_v23 = vsub.f32 %v6121_v10, %v2712_v63  ;;  %v6136_v45 = vpack.c.bf16 %v2604_v39, %v2601_v60  ;;  %v6138_v32 = vsub.f32 %v2567_v1, %v2601_v60  ;;  %v2569_v62 = vmax.f32 %v4800_v35, 0.0  ;;  %v4175_v31 = vpop.f32.mrb[12].mxu1 }
 0x31f   :  { %v2721_v13 = vand.u32 4294901760, %v2720_v57  ;;  %v2733_v18 = vand.u32 4294901760, %v6131_v58  ;;  %v2610_v21 = vand.u32 4294901760, %v2570_v3  ;;  %v4801_v33 = vadd.f32 %v4175_v31, %v6055_v9  ;;  %v2537_v55 = vpop.f32.mrb[13].mxu1 }
 0x320   :  { %v2714_v38 = vand.u32 4294901760, %v2713_v23  ;;  %v2726_v20 = vand.u32 4294901760, %v6138_v32  ;;  %v2607_v16 = vand.u32 4294901760, %v2569_v62  ;;  %v4802_v15 = vadd.f32 %v6055_v9, %v2537_v55  ;;  %4637 = vmatpush3.bf16.xpose.msra.mxu0 %v6101_v29 }
 0x321   :  { %v2734_v14 = vsub.f32 %v6131_v58, %v2733_v18  ;;  %v6148_v5 = vsub.f32 %v2570_v3, %v2610_v21  ;;  %v2572_v12 = vmax.f32 %v4801_v33, 0.0  ;;  %4638 = vmatprep.subr.bf16.mxu0 %v4993_v28  ;;  %v4660_v8 = vpack.c.bf16 %v2707_v41, %v2700_v7 }
 0x322   :  { %v2727_v40 = vsub.f32 %v6138_v32, %v2726_v20  ;;  %v6154_v43 = vpack.c.bf16 %v2610_v21, %v2607_v16  ;;  %v6156_v42 = vsub.f32 %v2569_v62, %v2607_v16  ;;  %v2571_v37 = vmax.f32 %v4802_v15, 0.0  ;;  %v4178_v53 = vpop.f32.mrb[14].mxu1 }
 0x323   :  { %v2735_v34 = vand.u32 4294901760, %v2734_v14  ;;  %v2747_v52 = vand.u32 4294901760, %v6148_v5  ;;  %v2616_v11 = vand.u32 4294901760, %v2572_v12  ;;  %4658 = vmatpush3.bf16.xpose.msra.mxu1 %v4657_v22  ;;  %v4803_v1 = vadd.f32 %v4178_v53, %v6055_v9  ;;  %v2549_v47 = vpop.f32.mrb[15].mxu1 }
 0x324   :  { %v2728_v39 = vand.u32 4294901760, %v2727_v40  ;;  %v2740_v41 = vand.u32 4294901760, %v6156_v42  ;;  %v2613_v26 = vand.u32 4294901760, %v2571_v37  ;;  %v4804_v24 = vadd.f32 %v6055_v9, %v2549_v47  ;;  %4659 = vmatprep.subr.bf16.mxu1 %v4993_v28 }
 0x325   :  { %v2748_v7 = vsub.f32 %v6148_v5, %v2747_v52  ;;  %v6164_v60 = vsub.f32 %v2572_v12, %v2616_v11  ;;  %v2574_v35 = vmax.f32 %v4803_v1, 0.0  ;;  %v4663_v57 = vpack.c.bf16 %v2721_v13, %v2714_v38 }
 0x326   :  { %v2741_v3 = vsub.f32 %v6156_v42, %v2740_v41  ;;  %v6167_v22 = vpack.c.bf16 %v2616_v11, %v2613_v26  ;;  %v6169_v23 = vsub.f32 %v2571_v37, %v2613_v26  ;;  %v2573_v62 = vmax.f32 %v4804_v24, 0.0 }
 0x327   :  { %v2749_v31 = vand.u32 4294901760, %v2748_v7  ;;  %v2761_v21 = vand.u32 4294901760, %v6164_v60  ;;  %v2622_v33 = vand.u32 4294901760, %v2574_v35  ;;  %v4666_v9 = vpack.c.bf16 %v2735_v34, %v2728_v39 }
 0x328   :  { %v2742_v55 = vand.u32 4294901760, %v2741_v3  ;;  %v2754_v16 = vand.u32 4294901760, %v6169_v23  ;;  %v2619_v15 = vand.u32 4294901760, %v2573_v62  ;;  %4640 = vmatpush3.bf16.xpose.msra.mxu0 %v6119_v44  ;;  %v4684_v13 = vpack.c.bf16 %v6094_v56, %v6103_v59 }
 0x329   :  { %v2762_v38 = vsub.f32 %v6164_v60, %v2761_v21  ;;  %v6177_v14 = vsub.f32 %v2574_v35, %v2622_v33  ;;  %4641 = vmatprep.subr.bf16.mxu0 %v4993_v28  ;;  %v4687_v12 = vpack.c.bf16 %v6113_v27, %v6121_v10  ;;  %v4690_v40 = vpack.c.bf16 %v6131_v58, %v6138_v32 }
 0x32a   :  { %v2755_v37 = vsub.f32 %v6169_v23, %v2754_v16  ;;  %v6185_v53 = vpack.c.bf16 %v2622_v33, %v2619_v15  ;;  %v6187_v34 = vsub.f32 %v2573_v62, %v2619_v15  ;;  %v4669_v11 = vpack.c.bf16 %v2749_v31, %v2742_v55 }
 0x32b   :  { %v2763_v1 = vand.u32 4294901760, %v2762_v38  ;;  %v2775_v47 = vand.u32 4294901760, %v6177_v14  ;;  %4661 = vmatpush3.bf16.xpose.msra.mxu1 %v4660_v8  ;;  %v4693_v39 = vpack.c.bf16 %v6148_v5, %v6156_v42  ;;  %v4696_v26 = vpack.c.bf16 %v6164_v60, %v6169_v23 }
 0x32c   :  { %v2756_v24 = vand.u32 4294901760, %v2755_v37  ;;  %v2768_v7 = vand.u32 4294901760, %v6187_v34  ;;  %4662 = vmatprep.subr.bf16.mxu1 %v4993_v28  ;;  %v4699_v35 = vpack.c.bf16 %v6177_v14, %v6187_v34  ;;  %v6202_v3 = vpack.c.bf16 %v2677_v30, %v2670_v0 }
 0x32d   :  { %v2776_v8 = vsub.f32 %v6177_v14, %v2775_v47  ;;  %v6209_v62 = vpack.c.bf16 %v2691_v25, %v2684_v49  ;;  %v6215_v31 = vpack.c.bf16 %v2705_v46, %v2698_v51  ;;  %v6221_v30 = vpack.c.bf16 %v2719_v54, %v2712_v63  ;;  %v2575_v63 = vld [vmem:[%s6364_s5] sm:$0xff] }
 0x32e   :  { %v2769_v0 = vsub.f32 %v6187_v34, %v2768_v7  ;;  %v4672_v33 = vpack.c.bf16 %v2763_v1, %v2756_v24  ;;  %v6228_v25 = vpack.c.bf16 %v2733_v18, %v2726_v20  ;;  %v6230_v49 = vpack.c.bf16 %v2747_v52, %v2740_v41 }
 0x32f   :  { %v2777_v55 = vand.u32 4294901760, %v2776_v8  ;;  %v6232_v46 = vpack.c.bf16 %v2761_v21, %v2754_v16  ;;  %v6234_v51 = vpack.c.bf16 %v2775_v47, %v2768_v7  ;;  %v6244_v18 = vand.u32 4294901760, %v2575_v63 }
 0x330   :  { %v2770_v15 = vand.u32 4294901760, %v2769_v0  ;;  %4643 = vmatpush3.bf16.xpose.msra.mxu0 %v6136_v45  ;;  %v3218_v10 = vstv %s6365_s6 }
 0x331   :  { %4644 = vmatprep.subr.bf16.mxu0 %v4993_v28  ;;  %v2658_v20 = vsub.f32 %v2575_v63, %v6244_v18 }
 0x332   :  { %v4675_v54 = vpack.c.bf16 %v2777_v55, %v2770_v15 }
 0x333   :  { %4664 = vmatpush3.bf16.xpose.msra.mxu1 %v4663_v57  ;;  %v2659_v52 = vand.u32 4294901760, %v2658_v20 }
 0x334   :  { %4665 = vmatprep.subr.bf16.mxu1 %v4993_v28 }
 0x335   :  { %v2660_v41 = vsub.f32 %v2658_v20, %v2659_v52 }
 0x337   :  { %v2661_v57 = vand.u32 4294901760, %v2660_v41 }
 0x338   :  { %4646 = vmatpush3.bf16.xpose.msra.mxu0 %v6154_v43 }
 0x339   :  { %4647 = vmatprep.subr.bf16.mxu0 %v4993_v28 }
 0x33b   :  { %4667 = vmatpush3.bf16.xpose.msra.mxu1 %v4666_v9 }
 0x33c   :  { %4668 = vmatprep.subr.bf16.mxu1 %v4993_v28 }
 0x340   :  { %4649 = vmatpush3.bf16.xpose.msra.mxu0 %v6167_v22 }
 0x341   :  { %4650 = vmatprep.subr.bf16.mxu0 %v4993_v28 }
 0x343   :  { %4670 = vmatpush3.bf16.xpose.msra.mxu1 %v4669_v11 }
 0x344   :  { %4671 = vmatprep.subr.bf16.mxu1 %v4993_v28 }
 0x348   :  { %4652 = vmatpush3.bf16.xpose.msra.mxu0 %v6185_v53 }
 0x349   :  { %4677 = vmatprep.subr.bf16.mxu0 %v4993_v28 }
 0x34b   :  { %4673 = vmatpush3.bf16.xpose.msra.mxu1 %v4672_v33 }
 0x34c   :  { %4674 = vmatprep.subr.bf16.mxu1 %v4993_v28 }
 0x34f   :  { %4212 = vmatmul.mubr.f32.vlgmr.msra.gmra.mrb[16].mxu0 %v2661_v57 }
 0x350   :  { %4679 = vmatpush3.bf16.xpose.msra.mxu0 %v4678_v48  ;;  %4281 = vmatprep.mubr.msk.f32.mxu0 %vm4994_vm1, %v4995_v6 }
 0x351   :  { %4680 = vmatprep.subr.bf16.mxu0 %v4993_v28 }
 0x353   :  { %4676 = vmatpush3.bf16.xpose.msra.mxu1 %v4675_v54 }
 0x354   :  { %4701 = vmatprep.subr.bf16.mxu1 %v4993_v28 }
 0x358   :  { %4682 = vmatpush3.bf16.xpose.msra.mxu0 %v4681_v17 }
 0x359   :  { %4683 = vmatprep.subr.bf16.mxu0 %v4993_v28 }
 0x35a   :  { %4247 = vmatmul.mubr.f32.vlgmr.msra.gmra.mrb[16].mxu1 %v6244_v18 }
 0x35b   :  { %4703 = vmatpush3.bf16.xpose.msra.mxu1 %v6063_v61  ;;  %4316 = vmatprep.mubr.msk.f32.mxu1 %vm4994_vm1, %v4995_v6 }
 0x35c   :  { %4704 = vmatprep.subr.bf16.mxu1 %v4993_v28 }
 0x360   :  { %4685 = vmatpush3.bf16.xpose.msra.mxu0 %v4684_v13 }
 0x361   :  { %4686 = vmatprep.subr.bf16.mxu0 %v4993_v28 }
 0x363   :  { %4706 = vmatpush3.bf16.xpose.msra.mxu1 %v6083_v36 }
 0x364   :  { %4707 = vmatprep.subr.bf16.mxu1 %v4993_v28 }
 0x368   :  { %4688 = vmatpush3.bf16.xpose.msra.mxu0 %v4687_v12 }
 0x369   :  { %4689 = vmatprep.subr.bf16.mxu0 %v4993_v28 }
 0x36b   :  { %4709 = vmatpush3.bf16.xpose.msra.mxu1 %v6101_v29 }
 0x36c   :  { %4710 = vmatprep.subr.bf16.mxu1 %v4993_v28 }
 0x370   :  { %4691 = vmatpush3.bf16.xpose.msra.mxu0 %v4690_v40 }
 0x371   :  { %4692 = vmatprep.subr.bf16.mxu0 %v4993_v28 }
 0x373   :  { %4712 = vmatpush3.bf16.xpose.msra.mxu1 %v6119_v44 }
 0x374   :  { %4713 = vmatprep.subr.bf16.mxu1 %v4993_v28 }
 0x378   :  { %4694 = vmatpush3.bf16.xpose.msra.mxu0 %v4693_v39 }
 0x379   :  { %4695 = vmatprep.subr.bf16.mxu0 %v4993_v28 }
 0x37b   :  { %4715 = vmatpush3.bf16.xpose.msra.mxu1 %v6136_v45 }
 0x37c   :  { %4716 = vmatprep.subr.bf16.mxu1 %v4993_v28 }
 0x380   :  { %4697 = vmatpush3.bf16.xpose.msra.mxu0 %v4696_v26 }
 0x381   :  { %4698 = vmatprep.subr.bf16.mxu0 %v4993_v28 }
 0x383   :  { %4718 = vmatpush3.bf16.xpose.msra.mxu1 %v6154_v43 }
 0x384   :  { %4719 = vmatprep.subr.bf16.mxu1 %v4993_v28 }
 0x388   :  { %4700 = vmatpush3.bf16.xpose.msra.mxu0 %v4699_v35 }
 0x389   :  { %4725 = vmatprep.subr.bf16.mxu0 %v4993_v28 }
 0x38b   :  { %4721 = vmatpush3.bf16.xpose.msra.mxu1 %v6167_v22 }
 0x38c   :  { %4722 = vmatprep.subr.bf16.mxu1 %v4993_v28 }
 0x38f   :  { %4282 = vmatmul.mubr.f32.vlgmr.msra.gmra.mrb[18].mxu0 %v2658_v20 }
 0x390   :  { %4727 = vmatpush3.bf16.xpose.msra.mxu0 %v6202_v3  ;;  %4351 = vmatprep.mubr.msk.f32.mxu0 %vm4994_vm1, %v4995_v6 }
 0x391   :  { %4728 = vmatprep.subr.bf16.mxu0 %v4993_v28 }
 0x393   :  { %4724 = vmatpush3.bf16.xpose.msra.mxu1 %v6185_v53 }
 0x394   :  { %4749 = vmatprep.subr.bf16.mxu1 %v4993_v28 }
 0x398   :  { %4730 = vmatpush3.bf16.xpose.msra.mxu0 %v6209_v62 }
 0x399   :  { %4731 = vmatprep.subr.bf16.mxu0 %v4993_v28 }
 0x39a   :  { %4317 = vmatmul.mubr.f32.vlgmr.msra.gmra.mrb[18].mxu1 %v2659_v52 }
 0x39b   :  { %4751 = vmatpush3.bf16.xpose.msra.mxu1 %v6063_v61  ;;  %4386 = vmatprep.mubr.msk.f32.mxu1 %vm4994_vm1, %v4995_v6 }
 0x39c   :  { %4752 = vmatprep.subr.bf16.mxu1 %v4993_v28 }
 0x3a0   :  { %4733 = vmatpush3.bf16.xpose.msra.mxu0 %v6215_v31 }
 0x3a1   :  { %4734 = vmatprep.subr.bf16.mxu0 %v4993_v28 }
 0x3a3   :  { %4754 = vmatpush3.bf16.xpose.msra.mxu1 %v6083_v36 }
 0x3a4   :  { %4755 = vmatprep.subr.bf16.mxu1 %v4993_v28 }
 0x3a8   :  { %4736 = vmatpush3.bf16.xpose.msra.mxu0 %v6221_v30 }
 0x3a9   :  { %4737 = vmatprep.subr.bf16.mxu0 %v4993_v28 }
 0x3ab   :  { %4757 = vmatpush3.bf16.xpose.msra.mxu1 %v6101_v29 }
 0x3ac   :  { %4758 = vmatprep.subr.bf16.mxu1 %v4993_v28 }
 0x3b0   :  { %4739 = vmatpush3.bf16.xpose.msra.mxu0 %v6228_v25 }
 0x3b1   :  { %4740 = vmatprep.subr.bf16.mxu0 %v4993_v28 }
 0x3b3   :  { %4760 = vmatpush3.bf16.xpose.msra.mxu1 %v6119_v44 }
 0x3b4   :  { %4761 = vmatprep.subr.bf16.mxu1 %v4993_v28 }
 0x3b8   :  { %4742 = vmatpush3.bf16.xpose.msra.mxu0 %v6230_v49 }
 0x3b9   :  { %4743 = vmatprep.subr.bf16.mxu0 %v4993_v28 }
 0x3bb   :  { %4763 = vmatpush3.bf16.xpose.msra.mxu1 %v6136_v45 }
 0x3bc   :  { %4764 = vmatprep.subr.bf16.mxu1 %v4993_v28 }
 0x3c0   :  { %4745 = vmatpush3.bf16.xpose.msra.mxu0 %v6232_v46 }
 0x3c1   :  { %4746 = vmatprep.subr.bf16.mxu0 %v4993_v28 }
 0x3c3   :  { %4766 = vmatpush3.bf16.xpose.msra.mxu1 %v6154_v43 }
 0x3c4   :  { %4767 = vmatprep.subr.bf16.mxu1 %v4993_v28 }
 0x3c8   :  { %4748 = vmatpush3.bf16.xpose.msra.mxu0 %v6234_v51 }
 0x3cb   :  { %4769 = vmatpush3.bf16.xpose.msra.mxu1 %v6167_v22 }
 0x3cc   :  { %4770 = vmatprep.subr.bf16.mxu1 %v4993_v28 }
 0x3cf   :  { %4352 = vmatmul.mubr.f32.vlgmr.msra.gmra.mrb[20].mxu0 %v6244_v18 }
 0x3d3   :  { %4772 = vmatpush3.bf16.xpose.msra.mxu1 %v6185_v53 }
 0x3da   :  { %4387 = vmatmul.mubr.f32.vlgmr.msra.gmra.mrb[20].mxu1 %v6244_v18 }
 0x422   :  { %v2663_v6 = vpop.f32.mrb[16].mxu0 }
 0x423   :  { %v4213_v19 = vpop.f32.mrb[17].mxu0 }
 0x42d   :  { %v2814_v61 = vpop.f32.mrb[16].mxu1 }
 0x42e   :  { %v2815_v2 = vadd.f32 %v2814_v61, %v2663_v6  ;;  %v4248_v48 = vpop.f32.mrb[17].mxu1 }
 0x462   :  { %v2918_v4 = vpop.f32.mrb[18].mxu0 }
 0x463   :  { %v2919_v36 = vadd.f32 %v2918_v4, %v2815_v2  ;;  %v4283_v50 = vpop.f32.mrb[19].mxu0 }
 0x46d   :  { %v3007_v56 = vpop.f32.mrb[18].mxu1 }
 0x46e   :  { %v3008_v17 = vadd.f32 %v3007_v56, %v2919_v36  ;;  %v4318_v29 = vpop.f32.mrb[19].mxu1 }
 0x4a2   :  { %v3126_v59 = vpop.f32.mrb[20].mxu0 }
 0x4a3   :  { %v3127_v27 = vadd.f32 %v3126_v59, %v3008_v17  ;;  %v4353_v28 = vpop.f32.mrb[21].mxu0 }
 0x4ad   :  { %v3213_v44 = vpop.f32.mrb[20].mxu1 }
 0x4ae   :  { %v3214_v58 = vadd.f32 %v3213_v44, %v3127_v27  ;;  %v4388_v45 = vpop.f32.mrb[21].mxu1 }
 0x4b0   :  { %v3219_v32 = vadd.f32 %v3218_v10, %v3214_v58 }
 0x4b2   :  { %3220 = vst [vmem:[#allocation3] sm:$0x1] %v3219_v32 }
 0x4b3   :  { %4980 = shalt.err (!%p4977_p4)
}
 0x4b4   :  { %s4981_s9 = scalar_lea.hbm %s6366_s7, 16 }
 0x4b5   :  { %p4982_p5 = scmp.ne.s32.totalorder %s6366_s7, %s4981_s9  ;;  %p4985_p6 = scmp.lt.u32.totalorder %s4981_s9, %s6366_s7 }
 0x4b7   :  { %p4987_p7 = pnand %p4985_p6, %p4982_p5 }
 0x4b9   :  { %4990 = shalt.err (!%p4987_p7)
}
 0x4ba   :  { %3230 = dma.vmem_to_hbm [thread:$0]  %s3228_s27, 16, %s6366_s7, [#allocation4]  }
 0x4bb   :  { %4991 = dma.done.wait [#allocation4], 16  }
 0x4bc   :  { %4992 = vsyncadd [#allocation4], 4294967280 }
 0x4bd   :  { %3234 = vsyncpa [#allocation4], 1 }

</bundles_post_ra>
